<compile_context>
chip_gen: v5e
topology: v5e:2x2
jax: 0.10.0
libtpu: 0.0.40
codegen_flags: <defaults>
</compile_context>

<pallas_src>
import functools

import jax
import jax.numpy as jnp
from jax.experimental import pallas as pl
from jax.experimental.pallas import tpu as pltpu

EPS = 1e-5  # PyTorch GroupNorm default eps


# ------------------------------------------------------------ kernel math ---

def _conv3x3(x, w, H, W, keep_l, keep_r):
    """3x3 / stride-1 / pad-1 conv on a (Cin, H*W) tile.

    x:  (Cin, HW) float32 activation tile (HW on the lane axis).
    w:  (Cout, 9*Cin) bfloat16 weights, tap-major / cin-minor, with tap order
        (dy, dx) row-major over dy, dx in {-1, 0, 1}.  A PyTorch
        (Cout, Cin, 3, 3) weight maps to this via
        w.transpose(0, 2, 3, 1).reshape(Cout, 9 * Cin).
    keep_l / keep_r: (1, HW) float32 column-validity masks for dx = -1 / +1.
    Returns (Cout, HW) float32.
    """
    Cin, HW = x.shape
    P = W + 1                                   # covers |dy*W + dx| <= W + 1
    zpad = jnp.zeros((Cin, P), dtype=x.dtype)
    xp = jnp.concatenate([zpad, x, zpad], axis=1)            # (Cin, HW + 2P)
    taps = []
    for dy in (-1, 0, 1):
        for dx in (-1, 0, 1):
            s = dy * W + dx
            t = jax.lax.slice_in_dim(xp, P + s, P + s + HW, axis=1)
            if dx == -1:
                t = t * keep_l                  # w == 0 has no left neighbor
            elif dx == 1:
                t = t * keep_r                  # w == W-1 has no right neighbor
            taps.append(t)
    patch = jnp.concatenate(taps, axis=0).astype(jnp.bfloat16)   # (9*Cin, HW)
    # bf16 x bf16 MXU matmul, f32 accumulation.
    return jnp.dot(w, patch, preferred_element_type=jnp.float32)


def _gn_tanh(y, gamma, beta):
    """Per-channel GroupNorm (num_groups == channels) + affine + tanh.

    Folded into a single per-element affine: tanh(y * scale + shift) where
    scale = gamma * rsqrt(var + eps), shift = beta - mean * scale.
    """
    inv_hw = 1.0 / y.shape[1]
    mean = jnp.sum(y, axis=1, keepdims=True) * inv_hw            # (C, 1)
    ex2 = jnp.sum(y * y, axis=1, keepdims=True) * inv_hw         # (C, 1)
    var = jnp.maximum(ex2 - mean * mean, 0.0)                    # biased var
    scale = gamma * jax.lax.rsqrt(var + EPS)                     # (C, 1)
    shift = beta - mean * scale                                  # (C, 1)
    return jnp.tanh(y * scale + shift)


def _squeeze_excite(gap, w1, b1, w2, b2):
    """sigmoid(W2 @ relu(W1 @ gap + b1) + b2);  gap is a (C, 1) column."""
    h = jnp.maximum(jnp.dot(w1, gap, preferred_element_type=jnp.float32) + b1, 0.0)
    return jax.nn.sigmoid(jnp.dot(w2, h, preferred_element_type=jnp.float32) + b2)


def outm_kernel(x_ref,
                w0_ref, g0_ref, b0_ref,
                caw1_ref, cab1_ref, caw2_ref, cab2_ref,
                pw1_ref, pg1_ref, pb1_ref,
                pw2_ref, pg2_ref, pb2_ref,
                pw3_ref, pcb3_ref,
                lw1_ref, lb1_ref, lw2_ref, lb2_ref,
                w1_ref, g1_ref, b1_ref,
                o_ref, *, H, W):
    HW = H * W
    # Column masks for the dx = +-1 taps: hoisted once, reused by all five
    # 3x3 convs (JAX does not CSE broadcast_in_dim).
    col = jax.lax.broadcasted_iota(jnp.int32, (1, HW), 1) % W
    keep_l = (col >= 1).astype(jnp.float32)
    keep_r = (col <= W - 2).astype(jnp.float32)

    x = x_ref[...].astype(jnp.float32)                       # (Cin, HW)

    # --- conv0: 3x3 conv (no bias) + GN + tanh ---------------------------
    y0 = _gn_tanh(_conv3x3(x, w0_ref[...], H, W, keep_l, keep_r),
                  g0_ref[...], b0_ref[...])                  # (Cm, HW)

    # --- CA: GAP -> 1x1 conv -> relu -> 1x1 conv -> sigmoid -> gate ------
    gap0 = jnp.mean(y0, axis=1, keepdims=True)               # (Cm, 1)
    a = _squeeze_excite(gap0,
                        caw1_ref[...], cab1_ref[...],
                        caw2_ref[...], cab2_ref[...])        # (Cm, 1)
    y1 = y0 * a                                              # (Cm, HW)

    # --- PDU -------------------------------------------------------------
    # GAP(y1) == GAP(y0) * a since `a` is a per-channel scalar: reuse gap0
    # instead of re-reducing the (Cm, HW) tile.
    x1 = _squeeze_excite(gap0 * a,
                         lw1_ref[...], lb1_ref[...],
                         lw2_ref[...], lb2_ref[...])         # (Cm, 1)
    t1 = _gn_tanh(_conv3x3(y1, pw1_ref[...], H, W, keep_l, keep_r),
                  pg1_ref[...], pb1_ref[...])
    t2 = _gn_tanh(_conv3x3(t1, pw2_ref[...], H, W, keep_l, keep_r),
                  pg2_ref[...], pb2_ref[...])
    g = jax.nn.sigmoid(
        _conv3x3(t2, pw3_ref[...], H, W, keep_l, keep_r) + pcb3_ref[...])
    # x1 * (1 - g) + y1 * g, fused form.
    y2 = x1 + g * (y1 - x1)                                  # (Cm, HW)

    # --- conv1: 3x3 conv (no bias) + GN + tanh ---------------------------
    y3 = _gn_tanh(_conv3x3(y2, w1_ref[...], H, W, keep_l, keep_r),
                  g1_ref[...], b1_ref[...])                  # (Co, HW)
    o_ref[...] = y3.astype(o_ref.dtype)


# -------------------------------------------------------------- wrapper -----

_PARAM_ORDER = ("w0", "g0", "b0",
                "ca_w1", "ca_b1", "ca_w2", "ca_b2",
                "pw1", "pg1", "pb1", "pw2", "pg2", "pb2", "pw3", "pcb3",
                "lw1", "lb1", "lw2", "lb2",
                "w1", "g1", "b1")


def out_m_forward(x_nchw, params):
    """Forward of outM.  x_nchw: (B, C_in, H, W) -> (B, C_out, H, W)."""
    B, Cin, H, W = x_nchw.shape
    HW = H * W
    Co = params["g1"].shape[0]
    x = x_nchw.reshape(B, Cin, HW)          # NCHW -> (B, C, HW): HW on lanes

    weights = [params[k] for k in _PARAM_ORDER]
    in_specs = [pl.BlockSpec((None, Cin, HW), lambda b: (b, 0, 0))]
    # Weights: whole (2-D) array every grid step; the block index never
    # changes across the batch grid so Pallas keeps them resident.
    in_specs += [pl.BlockSpec(w.shape, lambda b: (0, 0)) for w in weights]

    out = pl.pallas_call(
        functools.partial(outm_kernel, H=H, W=W),
        out_shape=jax.ShapeDtypeStruct((B, Co, HW), x_nchw.dtype),
        grid=(B,),
        in_specs=in_specs,
        out_specs=pl.BlockSpec((None, Co, HW), lambda b: (b, 0, 0)),
        compiler_params=pltpu.CompilerParams(
            # One image per grid step; batch points shard across the 2 TCs on
            # v7x, loop sequentially on single-TC v5e/v6e.
            dimension_semantics=("parallel",),
            # Tiny working set; explicit cap keeps us well inside v7x's
            # 64 MiB physical VMEM with double-buffering headroom.
            vmem_limit_bytes=32 * 1024 * 1024,
        ),
    )(x, *weights)
    return out.reshape(B, Co, H, W)


# ------------------------------------------------------------ parameters ----

def init_params(key, c_in, c_mid, c_out):
    """Random params.  Conv weights stored bf16 (MXU inputs), rest f32.

    Conv weight layout is (Cout, 9*Cin), tap-major / cin-minor; a PyTorch
    (Cout, Cin, 3, 3) weight maps via w.transpose(0, 2, 3, 1).reshape(...).
    Distinct PRNG key per parameter (no key reuse).
    """
    it = iter(jax.random.split(key, 24))

    def f(shape, scale=0.2):
        return (scale * jax.random.normal(next(it), shape)).astype(jnp.float32)

    def wconv(shape, scale=0.2):
        return (scale * jax.random.normal(next(it), shape)).astype(jnp.bfloat16)

    return dict(
        w0=wconv((c_mid, 9 * c_in)),
        g0=1.0 + f((c_mid, 1), 0.05), b0=f((c_mid, 1), 0.05),
        ca_w1=f((c_mid, c_mid)), ca_b1=f((c_mid, 1)),
        ca_w2=f((c_mid, c_mid)), ca_b2=f((c_mid, 1)),
        pw1=wconv((c_mid, 9 * c_mid)),
        pg1=1.0 + f((c_mid, 1), 0.05), pb1=f((c_mid, 1), 0.05),
        pw2=wconv((c_mid, 9 * c_mid)),
        pg2=1.0 + f((c_mid, 1), 0.05), pb2=f((c_mid, 1), 0.05),
        pw3=wconv((c_mid, 9 * c_mid)), pcb3=f((c_mid, 1)),
        lw1=f((c_mid, c_mid)), lb1=f((c_mid, 1)),
        lw2=f((c_mid, c_mid)), lb2=f((c_mid, 1)),
        w1=wconv((c_out, 9 * c_mid)),
        g1=1.0 + f((c_out, 1), 0.05), b1=f((c_out, 1), 0.05),
    )


# ----------------------------------------------- pure-JAX f32 reference -----

def _ref_conv3x3(x, w_flat):
    Cout = w_flat.shape[0]
    Cin = x.shape[1]
    w = w_flat.astype(jnp.float32).reshape(Cout, 3, 3, Cin).transpose(0, 3, 1, 2)
    return jax.lax.conv_general_dilated(
        x, w, window_strides=(1, 1), padding=((1, 1), (1, 1)),
        dimension_numbers=("NCHW", "OIHW", "NCHW"))


def _ref_gn_tanh(y, gamma, beta):
    mean = jnp.mean(y, axis=(2, 3), keepdims=True)
    var = jnp.mean(jnp.square(y - mean), axis=(2, 3), keepdims=True)
    yn = (y - mean) * jax.lax.rsqrt(var + EPS)
    return jnp.tanh(yn * gamma.reshape(1, -1, 1, 1) + beta.reshape(1, -1, 1, 1))


def _ref_se(gap, w1, b1, w2, b2):
    h = jnp.maximum(gap @ w1.T + b1.reshape(1, -1), 0.0)
    return jax.nn.sigmoid(h @ w2.T + b2.reshape(1, -1))


def out_m_reference(x, p):
    y0 = _ref_gn_tanh(_ref_conv3x3(x, p["w0"]), p["g0"], p["b0"])
    a = _ref_se(jnp.mean(y0, axis=(2, 3)),
                p["ca_w1"], p["ca_b1"], p["ca_w2"], p["ca_b2"])
    y1 = y0 * a[:, :, None, None]
    x1 = _ref_se(jnp.mean(y1, axis=(2, 3)),
                 p["lw1"], p["lb1"], p["lw2"], p["lb2"])
    t1 = _ref_gn_tanh(_ref_conv3x3(y1, p["pw1"]), p["pg1"], p["pb1"])
    t2 = _ref_gn_tanh(_ref_conv3x3(t1, p["pw2"]), p["pg2"], p["pb2"])
    g = jax.nn.sigmoid(_ref_conv3x3(t2, p["pw3"]) + p["pcb3"].reshape(1, -1, 1, 1))
    y2 = x1[:, :, None, None] * (1.0 - g) + y1 * g
    return _ref_gn_tanh(_ref_conv3x3(y2, p["w1"]), p["g1"], p["b1"])


# ----------------------------------------------------------------- main -----

if __name__ == "__main__":
    B, C_IN, C_MID, C_OUT, H, W = 2, 4, 8, 4, 16, 16
    key = jax.random.PRNGKey(0)
    kx, kp = jax.random.split(key)
    x = jax.random.normal(kx, (B, C_IN, H, W), dtype=jnp.float32)
    params = init_params(kp, C_IN, C_MID, C_OUT)

    out = jax.jit(out_m_forward)(x, params)
    jax.block_until_ready(out)
    assert out.shape == (B, C_OUT, H, W)
    assert bool(jnp.all(jnp.isfinite(out)))

    # Parity vs the pure-JAX f32 reference (kernel matmuls run in bf16).
    ref = out_m_reference(x, params)
    max_err = float(jnp.max(jnp.abs(out - ref)))
    assert max_err < 0.1, f"kernel vs reference max abs err {max_err}"

    print("KERNEL_OK")
</pallas_src>

<mosaic_0001>
module attributes {stable_mosaic.version = 11 : i64} {
  func.func @outm_kernel(%arg0: i32, %arg1: memref<1x4x256xf32, #tpu.memory_space<vmem>>, %arg2: memref<8x36xbf16, #tpu.memory_space<vmem>>, %arg3: memref<8x1xf32, #tpu.memory_space<vmem>>, %arg4: memref<8x1xf32, #tpu.memory_space<vmem>>, %arg5: memref<8x8xf32, #tpu.memory_space<vmem>>, %arg6: memref<8x1xf32, #tpu.memory_space<vmem>>, %arg7: memref<8x8xf32, #tpu.memory_space<vmem>>, %arg8: memref<8x1xf32, #tpu.memory_space<vmem>>, %arg9: memref<8x72xbf16, #tpu.memory_space<vmem>>, %arg10: memref<8x1xf32, #tpu.memory_space<vmem>>, %arg11: memref<8x1xf32, #tpu.memory_space<vmem>>, %arg12: memref<8x72xbf16, #tpu.memory_space<vmem>>, %arg13: memref<8x1xf32, #tpu.memory_space<vmem>>, %arg14: memref<8x1xf32, #tpu.memory_space<vmem>>, %arg15: memref<8x72xbf16, #tpu.memory_space<vmem>>, %arg16: memref<8x1xf32, #tpu.memory_space<vmem>>, %arg17: memref<8x8xf32, #tpu.memory_space<vmem>>, %arg18: memref<8x1xf32, #tpu.memory_space<vmem>>, %arg19: memref<8x8xf32, #tpu.memory_space<vmem>>, %arg20: memref<8x1xf32, #tpu.memory_space<vmem>>, %arg21: memref<4x72xbf16, #tpu.memory_space<vmem>>, %arg22: memref<4x1xf32, #tpu.memory_space<vmem>>, %arg23: memref<4x1xf32, #tpu.memory_space<vmem>>, %arg24: memref<1x4x256xf32, #tpu.memory_space<vmem>>) attributes {dimension_semantics = [#tpu.dimension_semantics<parallel>], iteration_bounds = array<i64: 2>, scalar_prefetch = 0 : i64, scratch_operands = 0 : i64, tpu.core_type = #tpu.core_type<tc>, window_params = [{transform_indices = @transform_0, window_bounds = array<i64: 1, 4, 256>}, {pipeline_mode = #tpu.pipeline_mode<synchronous>, transform_indices = @transform_1, window_bounds = array<i64: 8, 36>}, {pipeline_mode = #tpu.pipeline_mode<synchronous>, transform_indices = @transform_2, window_bounds = array<i64: 8, 1>}, {pipeline_mode = #tpu.pipeline_mode<synchronous>, transform_indices = @transform_3, window_bounds = array<i64: 8, 1>}, {pipeline_mode = #tpu.pipeline_mode<synchronous>, transform_indices = @transform_4, window_bounds = array<i64: 8, 8>}, {pipeline_mode = #tpu.pipeline_mode<synchronous>, transform_indices = @transform_5, window_bounds = array<i64: 8, 1>}, {pipeline_mode = #tpu.pipeline_mode<synchronous>, transform_indices = @transform_6, window_bounds = array<i64: 8, 8>}, {pipeline_mode = #tpu.pipeline_mode<synchronous>, transform_indices = @transform_7, window_bounds = array<i64: 8, 1>}, {pipeline_mode = #tpu.pipeline_mode<synchronous>, transform_indices = @transform_8, window_bounds = array<i64: 8, 72>}, {pipeline_mode = #tpu.pipeline_mode<synchronous>, transform_indices = @transform_9, window_bounds = array<i64: 8, 1>}, {pipeline_mode = #tpu.pipeline_mode<synchronous>, transform_indices = @transform_10, window_bounds = array<i64: 8, 1>}, {pipeline_mode = #tpu.pipeline_mode<synchronous>, transform_indices = @transform_11, window_bounds = array<i64: 8, 72>}, {pipeline_mode = #tpu.pipeline_mode<synchronous>, transform_indices = @transform_12, window_bounds = array<i64: 8, 1>}, {pipeline_mode = #tpu.pipeline_mode<synchronous>, transform_indices = @transform_13, window_bounds = array<i64: 8, 1>}, {pipeline_mode = #tpu.pipeline_mode<synchronous>, transform_indices = @transform_14, window_bounds = array<i64: 8, 72>}, {pipeline_mode = #tpu.pipeline_mode<synchronous>, transform_indices = @transform_15, window_bounds = array<i64: 8, 1>}, {pipeline_mode = #tpu.pipeline_mode<synchronous>, transform_indices = @transform_16, window_bounds = array<i64: 8, 8>}, {pipeline_mode = #tpu.pipeline_mode<synchronous>, transform_indices = @transform_17, window_bounds = array<i64: 8, 1>}, {pipeline_mode = #tpu.pipeline_mode<synchronous>, transform_indices = @transform_18, window_bounds = array<i64: 8, 8>}, {pipeline_mode = #tpu.pipeline_mode<synchronous>, transform_indices = @transform_19, window_bounds = array<i64: 8, 1>}, {pipeline_mode = #tpu.pipeline_mode<synchronous>, transform_indices = @transform_20, window_bounds = array<i64: 4, 72>}, {pipeline_mode = #tpu.pipeline_mode<synchronous>, transform_indices = @transform_21, window_bounds = array<i64: 4, 1>}, {pipeline_mode = #tpu.pipeline_mode<synchronous>, transform_indices = @transform_22, window_bounds = array<i64: 4, 1>}, {transform_indices = @transform_23, window_bounds = array<i64: 1, 4, 256>}]} {
    %0 = tpu.iota {dimensions = array<i32: 1>} : vector<1x256xi32>
    %c16_i32 = arith.constant 16 : i32
    %c0_i32 = arith.constant 0 : i32
    %1 = arith.cmpi eq, %c16_i32, %c0_i32 : i32
    %c1_i32 = arith.constant 1 : i32
    %2 = arith.select %1, %c1_i32, %c16_i32 : i32
    %3 = vector.broadcast %2 : i32 to vector<1x256xi32>
    %4 = arith.remsi %0, %3 : vector<1x256xi32>
    %c0_i32_0 = arith.constant 0 : i32
    %5 = vector.broadcast %c0_i32_0 : i32 to vector<1x256xi32>
    %6 = arith.cmpi ne, %4, %5 : vector<1x256xi32>
    %c0_i32_1 = arith.constant 0 : i32
    %7 = vector.broadcast %c0_i32_1 : i32 to vector<1x256xi32>
    %8 = arith.cmpi slt, %4, %7 : vector<1x256xi32>
    %c0_i32_2 = arith.constant 0 : i32
    %9 = arith.cmpi slt, %2, %c0_i32_2 : i32
    %10 = vector.broadcast %9 : i1 to vector<1x256xi1>
    %11 = vector.broadcast %10 : vector<1x256xi1> to vector<1x256xi1>
    %12 = arith.xori %8, %11 : vector<1x256xi1>
    %13 = arith.andi %12, %6 : vector<1x256xi1>
    %14 = vector.broadcast %2 : i32 to vector<1x256xi32>
    %15 = arith.addi %4, %14 : vector<1x256xi32>
    %16 = arith.select %13, %15, %4 : vector<1x256xi1>, vector<1x256xi32>
    %c1_i32_3 = arith.constant 1 : i32
    %17 = vector.broadcast %c1_i32_3 : i32 to vector<1x256xi32>
    %18 = arith.cmpi sge, %16, %17 : vector<1x256xi32>
    %19 = arith.extui %18 : vector<1x256xi1> to vector<1x256xi32>
    %20 = arith.sitofp %19 : vector<1x256xi32> to vector<1x256xf32>
    %c14_i32 = arith.constant 14 : i32
    %21 = vector.broadcast %c14_i32 : i32 to vector<1x256xi32>
    %22 = arith.cmpi sle, %16, %21 : vector<1x256xi32>
    %23 = arith.extui %22 : vector<1x256xi1> to vector<1x256xi32>
    %24 = arith.sitofp %23 : vector<1x256xi32> to vector<1x256xf32>
    %c0 = arith.constant 0 : index
    %c0_4 = arith.constant 0 : index
    %c0_5 = arith.constant 0 : index
    %25 = vector.load %arg1[%c0, %c0_4, %c0_5] : memref<1x4x256xf32, #tpu.memory_space<vmem>>, vector<1x4x256xf32>
    %26 = vector.shape_cast %25 : vector<1x4x256xf32> to vector<4x256xf32>
    %c0_6 = arith.constant 0 : index
    %c0_7 = arith.constant 0 : index
    %27 = vector.load %arg2[%c0_6, %c0_7] : memref<8x36xbf16, #tpu.memory_space<vmem>>, vector<8x36xbf16>
    %cst = arith.constant 0.000000e+00 : f32
    %28 = vector.broadcast %cst : f32 to vector<4x17xf32>
    %29 = tpu.concatenate %28, %26, %28 in 1 : vector<4x17xf32>, vector<4x256xf32>, vector<4x17xf32> -> vector<4x290xf32>
    %30 = vector.extract_strided_slice %29 {offsets = [0, 0], sizes = [4, 256], strides = [1, 1]} : vector<4x290xf32> to vector<4x256xf32>
    %31 = vector.broadcast %20 : vector<1x256xf32> to vector<4x256xf32>
    %32 = arith.mulf %30, %31 : vector<4x256xf32>
    %33 = vector.extract_strided_slice %29 {offsets = [0, 1], sizes = [4, 256], strides = [1, 1]} : vector<4x290xf32> to vector<4x256xf32>
    %34 = vector.extract_strided_slice %29 {offsets = [0, 2], sizes = [4, 256], strides = [1, 1]} : vector<4x290xf32> to vector<4x256xf32>
    %35 = vector.broadcast %24 : vector<1x256xf32> to vector<4x256xf32>
    %36 = arith.mulf %34, %35 : vector<4x256xf32>
    %37 = vector.extract_strided_slice %29 {offsets = [0, 16], sizes = [4, 256], strides = [1, 1]} : vector<4x290xf32> to vector<4x256xf32>
    %38 = vector.broadcast %20 : vector<1x256xf32> to vector<4x256xf32>
    %39 = arith.mulf %37, %38 : vector<4x256xf32>
    %40 = vector.extract_strided_slice %29 {offsets = [0, 17], sizes = [4, 256], strides = [1, 1]} : vector<4x290xf32> to vector<4x256xf32>
    %41 = vector.extract_strided_slice %29 {offsets = [0, 18], sizes = [4, 256], strides = [1, 1]} : vector<4x290xf32> to vector<4x256xf32>
    %42 = vector.broadcast %24 : vector<1x256xf32> to vector<4x256xf32>
    %43 = arith.mulf %41, %42 : vector<4x256xf32>
    %44 = vector.extract_strided_slice %29 {offsets = [0, 32], sizes = [4, 256], strides = [1, 1]} : vector<4x290xf32> to vector<4x256xf32>
    %45 = vector.broadcast %20 : vector<1x256xf32> to vector<4x256xf32>
    %46 = arith.mulf %44, %45 : vector<4x256xf32>
    %47 = vector.extract_strided_slice %29 {offsets = [0, 33], sizes = [4, 256], strides = [1, 1]} : vector<4x290xf32> to vector<4x256xf32>
    %48 = vector.extract_strided_slice %29 {offsets = [0, 34], sizes = [4, 256], strides = [1, 1]} : vector<4x290xf32> to vector<4x256xf32>
    %49 = vector.broadcast %24 : vector<1x256xf32> to vector<4x256xf32>
    %50 = arith.mulf %48, %49 : vector<4x256xf32>
    %51 = tpu.concatenate %32, %33, %36, %39, %40, %43, %46, %47, %50 in 0 : vector<4x256xf32>, vector<4x256xf32>, vector<4x256xf32>, vector<4x256xf32>, vector<4x256xf32>, vector<4x256xf32>, vector<4x256xf32>, vector<4x256xf32>, vector<4x256xf32> -> vector<36x256xf32>
    %52 = arith.truncf %51 : vector<36x256xf32> to vector<36x256xbf16>
    %cst_8 = arith.constant dense<0.000000e+00> : vector<8x256xf32>
    %53 = tpu.matmul %27, %52, %cst_8 {dimension_numbers = #tpu.dot_dimension_numbers<[1], [0], [0], [1], [0, 0, 1, 1], [], []>} : vector<8x36xbf16>, vector<36x256xbf16>, vector<8x256xf32> -> vector<8x256xf32>
    %c0_9 = arith.constant 0 : index
    %c0_10 = arith.constant 0 : index
    %54 = vector.load %arg3[%c0_9, %c0_10] : memref<8x1xf32, #tpu.memory_space<vmem>>, vector<8x1xf32>
    %c0_11 = arith.constant 0 : index
    %c0_12 = arith.constant 0 : index
    %55 = vector.load %arg4[%c0_11, %c0_12] : memref<8x1xf32, #tpu.memory_space<vmem>>, vector<8x1xf32>
    %cst_13 = arith.constant dense<0.000000e+00> : vector<8xf32>
    %56 = vector.multi_reduction <add>, %53, %cst_13 [1] : vector<8x256xf32> to vector<8xf32>
    %57 = vector.shape_cast %56 : vector<8xf32> to vector<8x1xf32>
    %cst_14 = arith.constant 3.906250e-03 : f32
    %58 = vector.broadcast %cst_14 : f32 to vector<8x1xf32>
    %59 = arith.mulf %57, %58 : vector<8x1xf32>
    %60 = arith.mulf %53, %53 : vector<8x256xf32>
    %cst_15 = arith.constant dense<0.000000e+00> : vector<8xf32>
    %61 = vector.multi_reduction <add>, %60, %cst_15 [1] : vector<8x256xf32> to vector<8xf32>
    %62 = vector.shape_cast %61 : vector<8xf32> to vector<8x1xf32>
    %cst_16 = arith.constant 3.906250e-03 : f32
    %63 = vector.broadcast %cst_16 : f32 to vector<8x1xf32>
    %64 = arith.mulf %62, %63 : vector<8x1xf32>
    %65 = arith.mulf %59, %59 : vector<8x1xf32>
    %66 = arith.subf %64, %65 : vector<8x1xf32>
    %cst_17 = arith.constant 0.000000e+00 : f32
    %67 = vector.broadcast %cst_17 : f32 to vector<8x1xf32>
    %68 = arith.maximumf %66, %67 : vector<8x1xf32>
    %cst_18 = arith.constant 9.99999974E-6 : f32
    %69 = vector.broadcast %cst_18 : f32 to vector<8x1xf32>
    %70 = arith.addf %68, %69 : vector<8x1xf32>
    %71 = math.rsqrt %70 : vector<8x1xf32>
    %72 = arith.mulf %54, %71 : vector<8x1xf32>
    %73 = arith.mulf %59, %72 : vector<8x1xf32>
    %74 = arith.subf %55, %73 : vector<8x1xf32>
    %75 = vector.broadcast %72 : vector<8x1xf32> to vector<8x256xf32>
    %76 = arith.mulf %53, %75 : vector<8x256xf32>
    %77 = vector.broadcast %74 : vector<8x1xf32> to vector<8x256xf32>
    %78 = arith.addf %76, %77 : vector<8x256xf32>
    %79 = math.tanh %78 : vector<8x256xf32>
    %cst_19 = arith.constant dense<0.000000e+00> : vector<8xf32>
    %80 = vector.multi_reduction <add>, %79, %cst_19 [1] : vector<8x256xf32> to vector<8xf32>
    %81 = vector.shape_cast %80 : vector<8xf32> to vector<8x1xf32>
    %cst_20 = arith.constant 2.560000e+02 : f32
    %82 = vector.broadcast %cst_20 : f32 to vector<8x1xf32>
    %83 = arith.divf %81, %82 : vector<8x1xf32>
    %c0_21 = arith.constant 0 : index
    %c0_22 = arith.constant 0 : index
    %84 = vector.load %arg5[%c0_21, %c0_22] : memref<8x8xf32, #tpu.memory_space<vmem>>, vector<8x8xf32>
    %c0_23 = arith.constant 0 : index
    %c0_24 = arith.constant 0 : index
    %85 = vector.load %arg6[%c0_23, %c0_24] : memref<8x1xf32, #tpu.memory_space<vmem>>, vector<8x1xf32>
    %c0_25 = arith.constant 0 : index
    %c0_26 = arith.constant 0 : index
    %86 = vector.load %arg7[%c0_25, %c0_26] : memref<8x8xf32, #tpu.memory_space<vmem>>, vector<8x8xf32>
    %c0_27 = arith.constant 0 : index
    %c0_28 = arith.constant 0 : index
    %87 = vector.load %arg8[%c0_27, %c0_28] : memref<8x1xf32, #tpu.memory_space<vmem>>, vector<8x1xf32>
    %cst_29 = arith.constant dense<0.000000e+00> : vector<8x1xf32>
    %88 = tpu.matmul %84, %83, %cst_29 {dimension_numbers = #tpu.dot_dimension_numbers<[1], [0], [0], [1], [0, 0, 1, 1], [], []>} : vector<8x8xf32>, vector<8x1xf32>, vector<8x1xf32> -> vector<8x1xf32>
    %89 = arith.addf %88, %85 : vector<8x1xf32>
    %cst_30 = arith.constant 0.000000e+00 : f32
    %90 = vector.broadcast %cst_30 : f32 to vector<8x1xf32>
    %91 = arith.maximumf %89, %90 : vector<8x1xf32>
    %cst_31 = arith.constant dense<0.000000e+00> : vector<8x1xf32>
    %92 = tpu.matmul %86, %91, %cst_31 {dimension_numbers = #tpu.dot_dimension_numbers<[1], [0], [0], [1], [0, 0, 1, 1], [], []>} : vector<8x8xf32>, vector<8x1xf32>, vector<8x1xf32> -> vector<8x1xf32>
    %93 = arith.addf %92, %87 : vector<8x1xf32>
    %94 = arith.negf %93 : vector<8x1xf32>
    %95 = math.exp %94 : vector<8x1xf32>
    %cst_32 = arith.constant 1.000000e+00 : f32
    %96 = vector.broadcast %cst_32 : f32 to vector<8x1xf32>
    %97 = arith.addf %96, %95 : vector<8x1xf32>
    %98 = arith.divf %96, %97 : vector<8x1xf32>
    %99 = vector.broadcast %98 : vector<8x1xf32> to vector<8x256xf32>
    %100 = arith.mulf %79, %99 : vector<8x256xf32>
    %101 = arith.mulf %83, %98 : vector<8x1xf32>
    %c0_33 = arith.constant 0 : index
    %c0_34 = arith.constant 0 : index
    %102 = vector.load %arg17[%c0_33, %c0_34] : memref<8x8xf32, #tpu.memory_space<vmem>>, vector<8x8xf32>
    %c0_35 = arith.constant 0 : index
    %c0_36 = arith.constant 0 : index
    %103 = vector.load %arg18[%c0_35, %c0_36] : memref<8x1xf32, #tpu.memory_space<vmem>>, vector<8x1xf32>
    %c0_37 = arith.constant 0 : index
    %c0_38 = arith.constant 0 : index
    %104 = vector.load %arg19[%c0_37, %c0_38] : memref<8x8xf32, #tpu.memory_space<vmem>>, vector<8x8xf32>
    %c0_39 = arith.constant 0 : index
    %c0_40 = arith.constant 0 : index
    %105 = vector.load %arg20[%c0_39, %c0_40] : memref<8x1xf32, #tpu.memory_space<vmem>>, vector<8x1xf32>
    %cst_41 = arith.constant dense<0.000000e+00> : vector<8x1xf32>
    %106 = tpu.matmul %102, %101, %cst_41 {dimension_numbers = #tpu.dot_dimension_numbers<[1], [0], [0], [1], [0, 0, 1, 1], [], []>} : vector<8x8xf32>, vector<8x1xf32>, vector<8x1xf32> -> vector<8x1xf32>
    %107 = arith.addf %106, %103 : vector<8x1xf32>
    %cst_42 = arith.constant 0.000000e+00 : f32
    %108 = vector.broadcast %cst_42 : f32 to vector<8x1xf32>
    %109 = arith.maximumf %107, %108 : vector<8x1xf32>
    %cst_43 = arith.constant dense<0.000000e+00> : vector<8x1xf32>
    %110 = tpu.matmul %104, %109, %cst_43 {dimension_numbers = #tpu.dot_dimension_numbers<[1], [0], [0], [1], [0, 0, 1, 1], [], []>} : vector<8x8xf32>, vector<8x1xf32>, vector<8x1xf32> -> vector<8x1xf32>
    %111 = arith.addf %110, %105 : vector<8x1xf32>
    %112 = arith.negf %111 : vector<8x1xf32>
    %113 = math.exp %112 : vector<8x1xf32>
    %cst_44 = arith.constant 1.000000e+00 : f32
    %114 = vector.broadcast %cst_44 : f32 to vector<8x1xf32>
    %115 = arith.addf %114, %113 : vector<8x1xf32>
    %116 = arith.divf %114, %115 : vector<8x1xf32>
    %c0_45 = arith.constant 0 : index
    %c0_46 = arith.constant 0 : index
    %117 = vector.load %arg9[%c0_45, %c0_46] : memref<8x72xbf16, #tpu.memory_space<vmem>>, vector<8x72xbf16>
    %cst_47 = arith.constant 0.000000e+00 : f32
    %118 = vector.broadcast %cst_47 : f32 to vector<8x17xf32>
    %119 = tpu.concatenate %118, %100, %118 in 1 : vector<8x17xf32>, vector<8x256xf32>, vector<8x17xf32> -> vector<8x290xf32>
    %120 = vector.extract_strided_slice %119 {offsets = [0, 0], sizes = [8, 256], strides = [1, 1]} : vector<8x290xf32> to vector<8x256xf32>
    %121 = vector.broadcast %20 : vector<1x256xf32> to vector<8x256xf32>
    %122 = arith.mulf %120, %121 : vector<8x256xf32>
    %123 = vector.extract_strided_slice %119 {offsets = [0, 1], sizes = [8, 256], strides = [1, 1]} : vector<8x290xf32> to vector<8x256xf32>
    %124 = vector.extract_strided_slice %119 {offsets = [0, 2], sizes = [8, 256], strides = [1, 1]} : vector<8x290xf32> to vector<8x256xf32>
    %125 = vector.broadcast %24 : vector<1x256xf32> to vector<8x256xf32>
    %126 = arith.mulf %124, %125 : vector<8x256xf32>
    %127 = vector.extract_strided_slice %119 {offsets = [0, 16], sizes = [8, 256], strides = [1, 1]} : vector<8x290xf32> to vector<8x256xf32>
    %128 = vector.broadcast %20 : vector<1x256xf32> to vector<8x256xf32>
    %129 = arith.mulf %127, %128 : vector<8x256xf32>
    %130 = vector.extract_strided_slice %119 {offsets = [0, 17], sizes = [8, 256], strides = [1, 1]} : vector<8x290xf32> to vector<8x256xf32>
    %131 = vector.extract_strided_slice %119 {offsets = [0, 18], sizes = [8, 256], strides = [1, 1]} : vector<8x290xf32> to vector<8x256xf32>
    %132 = vector.broadcast %24 : vector<1x256xf32> to vector<8x256xf32>
    %133 = arith.mulf %131, %132 : vector<8x256xf32>
    %134 = vector.extract_strided_slice %119 {offsets = [0, 32], sizes = [8, 256], strides = [1, 1]} : vector<8x290xf32> to vector<8x256xf32>
    %135 = vector.broadcast %20 : vector<1x256xf32> to vector<8x256xf32>
    %136 = arith.mulf %134, %135 : vector<8x256xf32>
    %137 = vector.extract_strided_slice %119 {offsets = [0, 33], sizes = [8, 256], strides = [1, 1]} : vector<8x290xf32> to vector<8x256xf32>
    %138 = vector.extract_strided_slice %119 {offsets = [0, 34], sizes = [8, 256], strides = [1, 1]} : vector<8x290xf32> to vector<8x256xf32>
    %139 = vector.broadcast %24 : vector<1x256xf32> to vector<8x256xf32>
    %140 = arith.mulf %138, %139 : vector<8x256xf32>
    %141 = tpu.concatenate %122, %123, %126, %129, %130, %133, %136, %137, %140 in 0 : vector<8x256xf32>, vector<8x256xf32>, vector<8x256xf32>, vector<8x256xf32>, vector<8x256xf32>, vector<8x256xf32>, vector<8x256xf32>, vector<8x256xf32>, vector<8x256xf32> -> vector<72x256xf32>
    %142 = arith.truncf %141 : vector<72x256xf32> to vector<72x256xbf16>
    %cst_48 = arith.constant dense<0.000000e+00> : vector<8x256xf32>
    %143 = tpu.matmul %117, %142, %cst_48 {dimension_numbers = #tpu.dot_dimension_numbers<[1], [0], [0], [1], [0, 0, 1, 1], [], []>} : vector<8x72xbf16>, vector<72x256xbf16>, vector<8x256xf32> -> vector<8x256xf32>
    %c0_49 = arith.constant 0 : index
    %c0_50 = arith.constant 0 : index
    %144 = vector.load %arg10[%c0_49, %c0_50] : memref<8x1xf32, #tpu.memory_space<vmem>>, vector<8x1xf32>
    %c0_51 = arith.constant 0 : index
    %c0_52 = arith.constant 0 : index
    %145 = vector.load %arg11[%c0_51, %c0_52] : memref<8x1xf32, #tpu.memory_space<vmem>>, vector<8x1xf32>
    %cst_53 = arith.constant dense<0.000000e+00> : vector<8xf32>
    %146 = vector.multi_reduction <add>, %143, %cst_53 [1] : vector<8x256xf32> to vector<8xf32>
    %147 = vector.shape_cast %146 : vector<8xf32> to vector<8x1xf32>
    %cst_54 = arith.constant 3.906250e-03 : f32
    %148 = vector.broadcast %cst_54 : f32 to vector<8x1xf32>
    %149 = arith.mulf %147, %148 : vector<8x1xf32>
    %150 = arith.mulf %143, %143 : vector<8x256xf32>
    %cst_55 = arith.constant dense<0.000000e+00> : vector<8xf32>
    %151 = vector.multi_reduction <add>, %150, %cst_55 [1] : vector<8x256xf32> to vector<8xf32>
    %152 = vector.shape_cast %151 : vector<8xf32> to vector<8x1xf32>
    %cst_56 = arith.constant 3.906250e-03 : f32
    %153 = vector.broadcast %cst_56 : f32 to vector<8x1xf32>
    %154 = arith.mulf %152, %153 : vector<8x1xf32>
    %155 = arith.mulf %149, %149 : vector<8x1xf32>
    %156 = arith.subf %154, %155 : vector<8x1xf32>
    %cst_57 = arith.constant 0.000000e+00 : f32
    %157 = vector.broadcast %cst_57 : f32 to vector<8x1xf32>
    %158 = arith.maximumf %156, %157 : vector<8x1xf32>
    %cst_58 = arith.constant 9.99999974E-6 : f32
    %159 = vector.broadcast %cst_58 : f32 to vector<8x1xf32>
    %160 = arith.addf %158, %159 : vector<8x1xf32>
    %161 = math.rsqrt %160 : vector<8x1xf32>
    %162 = arith.mulf %144, %161 : vector<8x1xf32>
    %163 = arith.mulf %149, %162 : vector<8x1xf32>
    %164 = arith.subf %145, %163 : vector<8x1xf32>
    %165 = vector.broadcast %162 : vector<8x1xf32> to vector<8x256xf32>
    %166 = arith.mulf %143, %165 : vector<8x256xf32>
    %167 = vector.broadcast %164 : vector<8x1xf32> to vector<8x256xf32>
    %168 = arith.addf %166, %167 : vector<8x256xf32>
    %169 = math.tanh %168 : vector<8x256xf32>
    %c0_59 = arith.constant 0 : index
    %c0_60 = arith.constant 0 : index
    %170 = vector.load %arg12[%c0_59, %c0_60] : memref<8x72xbf16, #tpu.memory_space<vmem>>, vector<8x72xbf16>
    %cst_61 = arith.constant 0.000000e+00 : f32
    %171 = vector.broadcast %cst_61 : f32 to vector<8x17xf32>
    %172 = tpu.concatenate %171, %169, %171 in 1 : vector<8x17xf32>, vector<8x256xf32>, vector<8x17xf32> -> vector<8x290xf32>
    %173 = vector.extract_strided_slice %172 {offsets = [0, 0], sizes = [8, 256], strides = [1, 1]} : vector<8x290xf32> to vector<8x256xf32>
    %174 = vector.broadcast %20 : vector<1x256xf32> to vector<8x256xf32>
    %175 = arith.mulf %173, %174 : vector<8x256xf32>
    %176 = vector.extract_strided_slice %172 {offsets = [0, 1], sizes = [8, 256], strides = [1, 1]} : vector<8x290xf32> to vector<8x256xf32>
    %177 = vector.extract_strided_slice %172 {offsets = [0, 2], sizes = [8, 256], strides = [1, 1]} : vector<8x290xf32> to vector<8x256xf32>
    %178 = vector.broadcast %24 : vector<1x256xf32> to vector<8x256xf32>
    %179 = arith.mulf %177, %178 : vector<8x256xf32>
    %180 = vector.extract_strided_slice %172 {offsets = [0, 16], sizes = [8, 256], strides = [1, 1]} : vector<8x290xf32> to vector<8x256xf32>
    %181 = vector.broadcast %20 : vector<1x256xf32> to vector<8x256xf32>
    %182 = arith.mulf %180, %181 : vector<8x256xf32>
    %183 = vector.extract_strided_slice %172 {offsets = [0, 17], sizes = [8, 256], strides = [1, 1]} : vector<8x290xf32> to vector<8x256xf32>
    %184 = vector.extract_strided_slice %172 {offsets = [0, 18], sizes = [8, 256], strides = [1, 1]} : vector<8x290xf32> to vector<8x256xf32>
    %185 = vector.broadcast %24 : vector<1x256xf32> to vector<8x256xf32>
    %186 = arith.mulf %184, %185 : vector<8x256xf32>
    %187 = vector.extract_strided_slice %172 {offsets = [0, 32], sizes = [8, 256], strides = [1, 1]} : vector<8x290xf32> to vector<8x256xf32>
    %188 = vector.broadcast %20 : vector<1x256xf32> to vector<8x256xf32>
    %189 = arith.mulf %187, %188 : vector<8x256xf32>
    %190 = vector.extract_strided_slice %172 {offsets = [0, 33], sizes = [8, 256], strides = [1, 1]} : vector<8x290xf32> to vector<8x256xf32>
    %191 = vector.extract_strided_slice %172 {offsets = [0, 34], sizes = [8, 256], strides = [1, 1]} : vector<8x290xf32> to vector<8x256xf32>
    %192 = vector.broadcast %24 : vector<1x256xf32> to vector<8x256xf32>
    %193 = arith.mulf %191, %192 : vector<8x256xf32>
    %194 = tpu.concatenate %175, %176, %179, %182, %183, %186, %189, %190, %193 in 0 : vector<8x256xf32>, vector<8x256xf32>, vector<8x256xf32>, vector<8x256xf32>, vector<8x256xf32>, vector<8x256xf32>, vector<8x256xf32>, vector<8x256xf32>, vector<8x256xf32> -> vector<72x256xf32>
    %195 = arith.truncf %194 : vector<72x256xf32> to vector<72x256xbf16>
    %cst_62 = arith.constant dense<0.000000e+00> : vector<8x256xf32>
    %196 = tpu.matmul %170, %195, %cst_62 {dimension_numbers = #tpu.dot_dimension_numbers<[1], [0], [0], [1], [0, 0, 1, 1], [], []>} : vector<8x72xbf16>, vector<72x256xbf16>, vector<8x256xf32> -> vector<8x256xf32>
    %c0_63 = arith.constant 0 : index
    %c0_64 = arith.constant 0 : index
    %197 = vector.load %arg13[%c0_63, %c0_64] : memref<8x1xf32, #tpu.memory_space<vmem>>, vector<8x1xf32>
    %c0_65 = arith.constant 0 : index
    %c0_66 = arith.constant 0 : index
    %198 = vector.load %arg14[%c0_65, %c0_66] : memref<8x1xf32, #tpu.memory_space<vmem>>, vector<8x1xf32>
    %cst_67 = arith.constant dense<0.000000e+00> : vector<8xf32>
    %199 = vector.multi_reduction <add>, %196, %cst_67 [1] : vector<8x256xf32> to vector<8xf32>
    %200 = vector.shape_cast %199 : vector<8xf32> to vector<8x1xf32>
    %cst_68 = arith.constant 3.906250e-03 : f32
    %201 = vector.broadcast %cst_68 : f32 to vector<8x1xf32>
    %202 = arith.mulf %200, %201 : vector<8x1xf32>
    %203 = arith.mulf %196, %196 : vector<8x256xf32>
    %cst_69 = arith.constant dense<0.000000e+00> : vector<8xf32>
    %204 = vector.multi_reduction <add>, %203, %cst_69 [1] : vector<8x256xf32> to vector<8xf32>
    %205 = vector.shape_cast %204 : vector<8xf32> to vector<8x1xf32>
    %cst_70 = arith.constant 3.906250e-03 : f32
    %206 = vector.broadcast %cst_70 : f32 to vector<8x1xf32>
    %207 = arith.mulf %205, %206 : vector<8x1xf32>
    %208 = arith.mulf %202, %202 : vector<8x1xf32>
    %209 = arith.subf %207, %208 : vector<8x1xf32>
    %cst_71 = arith.constant 0.000000e+00 : f32
    %210 = vector.broadcast %cst_71 : f32 to vector<8x1xf32>
    %211 = arith.maximumf %209, %210 : vector<8x1xf32>
    %cst_72 = arith.constant 9.99999974E-6 : f32
    %212 = vector.broadcast %cst_72 : f32 to vector<8x1xf32>
    %213 = arith.addf %211, %212 : vector<8x1xf32>
    %214 = math.rsqrt %213 : vector<8x1xf32>
    %215 = arith.mulf %197, %214 : vector<8x1xf32>
    %216 = arith.mulf %202, %215 : vector<8x1xf32>
    %217 = arith.subf %198, %216 : vector<8x1xf32>
    %218 = vector.broadcast %215 : vector<8x1xf32> to vector<8x256xf32>
    %219 = arith.mulf %196, %218 : vector<8x256xf32>
    %220 = vector.broadcast %217 : vector<8x1xf32> to vector<8x256xf32>
    %221 = arith.addf %219, %220 : vector<8x256xf32>
    %222 = math.tanh %221 : vector<8x256xf32>
    %c0_73 = arith.constant 0 : index
    %c0_74 = arith.constant 0 : index
    %223 = vector.load %arg15[%c0_73, %c0_74] : memref<8x72xbf16, #tpu.memory_space<vmem>>, vector<8x72xbf16>
    %cst_75 = arith.constant 0.000000e+00 : f32
    %224 = vector.broadcast %cst_75 : f32 to vector<8x17xf32>
    %225 = tpu.concatenate %224, %222, %224 in 1 : vector<8x17xf32>, vector<8x256xf32>, vector<8x17xf32> -> vector<8x290xf32>
    %226 = vector.extract_strided_slice %225 {offsets = [0, 0], sizes = [8, 256], strides = [1, 1]} : vector<8x290xf32> to vector<8x256xf32>
    %227 = vector.broadcast %20 : vector<1x256xf32> to vector<8x256xf32>
    %228 = arith.mulf %226, %227 : vector<8x256xf32>
    %229 = vector.extract_strided_slice %225 {offsets = [0, 1], sizes = [8, 256], strides = [1, 1]} : vector<8x290xf32> to vector<8x256xf32>
    %230 = vector.extract_strided_slice %225 {offsets = [0, 2], sizes = [8, 256], strides = [1, 1]} : vector<8x290xf32> to vector<8x256xf32>
    %231 = vector.broadcast %24 : vector<1x256xf32> to vector<8x256xf32>
    %232 = arith.mulf %230, %231 : vector<8x256xf32>
    %233 = vector.extract_strided_slice %225 {offsets = [0, 16], sizes = [8, 256], strides = [1, 1]} : vector<8x290xf32> to vector<8x256xf32>
    %234 = vector.broadcast %20 : vector<1x256xf32> to vector<8x256xf32>
    %235 = arith.mulf %233, %234 : vector<8x256xf32>
    %236 = vector.extract_strided_slice %225 {offsets = [0, 17], sizes = [8, 256], strides = [1, 1]} : vector<8x290xf32> to vector<8x256xf32>
    %237 = vector.extract_strided_slice %225 {offsets = [0, 18], sizes = [8, 256], strides = [1, 1]} : vector<8x290xf32> to vector<8x256xf32>
    %238 = vector.broadcast %24 : vector<1x256xf32> to vector<8x256xf32>
    %239 = arith.mulf %237, %238 : vector<8x256xf32>
    %240 = vector.extract_strided_slice %225 {offsets = [0, 32], sizes = [8, 256], strides = [1, 1]} : vector<8x290xf32> to vector<8x256xf32>
    %241 = vector.broadcast %20 : vector<1x256xf32> to vector<8x256xf32>
    %242 = arith.mulf %240, %241 : vector<8x256xf32>
    %243 = vector.extract_strided_slice %225 {offsets = [0, 33], sizes = [8, 256], strides = [1, 1]} : vector<8x290xf32> to vector<8x256xf32>
    %244 = vector.extract_strided_slice %225 {offsets = [0, 34], sizes = [8, 256], strides = [1, 1]} : vector<8x290xf32> to vector<8x256xf32>
    %245 = vector.broadcast %24 : vector<1x256xf32> to vector<8x256xf32>
    %246 = arith.mulf %244, %245 : vector<8x256xf32>
    %247 = tpu.concatenate %228, %229, %232, %235, %236, %239, %242, %243, %246 in 0 : vector<8x256xf32>, vector<8x256xf32>, vector<8x256xf32>, vector<8x256xf32>, vector<8x256xf32>, vector<8x256xf32>, vector<8x256xf32>, vector<8x256xf32>, vector<8x256xf32> -> vector<72x256xf32>
    %248 = arith.truncf %247 : vector<72x256xf32> to vector<72x256xbf16>
    %cst_76 = arith.constant dense<0.000000e+00> : vector<8x256xf32>
    %249 = tpu.matmul %223, %248, %cst_76 {dimension_numbers = #tpu.dot_dimension_numbers<[1], [0], [0], [1], [0, 0, 1, 1], [], []>} : vector<8x72xbf16>, vector<72x256xbf16>, vector<8x256xf32> -> vector<8x256xf32>
    %c0_77 = arith.constant 0 : index
    %c0_78 = arith.constant 0 : index
    %250 = vector.load %arg16[%c0_77, %c0_78] : memref<8x1xf32, #tpu.memory_space<vmem>>, vector<8x1xf32>
    %251 = vector.broadcast %250 : vector<8x1xf32> to vector<8x256xf32>
    %252 = arith.addf %249, %251 : vector<8x256xf32>
    %253 = arith.negf %252 : vector<8x256xf32>
    %254 = math.exp %253 : vector<8x256xf32>
    %cst_79 = arith.constant 1.000000e+00 : f32
    %255 = vector.broadcast %cst_79 : f32 to vector<8x256xf32>
    %256 = arith.addf %255, %254 : vector<8x256xf32>
    %257 = arith.divf %255, %256 : vector<8x256xf32>
    %258 = vector.broadcast %116 : vector<8x1xf32> to vector<8x256xf32>
    %259 = arith.subf %100, %258 : vector<8x256xf32>
    %260 = arith.mulf %257, %259 : vector<8x256xf32>
    %261 = vector.broadcast %116 : vector<8x1xf32> to vector<8x256xf32>
    %262 = arith.addf %261, %260 : vector<8x256xf32>
    %c0_80 = arith.constant 0 : index
    %c0_81 = arith.constant 0 : index
    %263 = vector.load %arg21[%c0_80, %c0_81] : memref<4x72xbf16, #tpu.memory_space<vmem>>, vector<4x72xbf16>
    %cst_82 = arith.constant 0.000000e+00 : f32
    %264 = vector.broadcast %cst_82 : f32 to vector<8x17xf32>
    %265 = tpu.concatenate %264, %262, %264 in 1 : vector<8x17xf32>, vector<8x256xf32>, vector<8x17xf32> -> vector<8x290xf32>
    %266 = vector.extract_strided_slice %265 {offsets = [0, 0], sizes = [8, 256], strides = [1, 1]} : vector<8x290xf32> to vector<8x256xf32>
    %267 = vector.broadcast %20 : vector<1x256xf32> to vector<8x256xf32>
    %268 = arith.mulf %266, %267 : vector<8x256xf32>
    %269 = vector.extract_strided_slice %265 {offsets = [0, 1], sizes = [8, 256], strides = [1, 1]} : vector<8x290xf32> to vector<8x256xf32>
    %270 = vector.extract_strided_slice %265 {offsets = [0, 2], sizes = [8, 256], strides = [1, 1]} : vector<8x290xf32> to vector<8x256xf32>
    %271 = vector.broadcast %24 : vector<1x256xf32> to vector<8x256xf32>
    %272 = arith.mulf %270, %271 : vector<8x256xf32>
    %273 = vector.extract_strided_slice %265 {offsets = [0, 16], sizes = [8, 256], strides = [1, 1]} : vector<8x290xf32> to vector<8x256xf32>
    %274 = vector.broadcast %20 : vector<1x256xf32> to vector<8x256xf32>
    %275 = arith.mulf %273, %274 : vector<8x256xf32>
    %276 = vector.extract_strided_slice %265 {offsets = [0, 17], sizes = [8, 256], strides = [1, 1]} : vector<8x290xf32> to vector<8x256xf32>
    %277 = vector.extract_strided_slice %265 {offsets = [0, 18], sizes = [8, 256], strides = [1, 1]} : vector<8x290xf32> to vector<8x256xf32>
    %278 = vector.broadcast %24 : vector<1x256xf32> to vector<8x256xf32>
    %279 = arith.mulf %277, %278 : vector<8x256xf32>
    %280 = vector.extract_strided_slice %265 {offsets = [0, 32], sizes = [8, 256], strides = [1, 1]} : vector<8x290xf32> to vector<8x256xf32>
    %281 = vector.broadcast %20 : vector<1x256xf32> to vector<8x256xf32>
    %282 = arith.mulf %280, %281 : vector<8x256xf32>
    %283 = vector.extract_strided_slice %265 {offsets = [0, 33], sizes = [8, 256], strides = [1, 1]} : vector<8x290xf32> to vector<8x256xf32>
    %284 = vector.extract_strided_slice %265 {offsets = [0, 34], sizes = [8, 256], strides = [1, 1]} : vector<8x290xf32> to vector<8x256xf32>
    %285 = vector.broadcast %24 : vector<1x256xf32> to vector<8x256xf32>
    %286 = arith.mulf %284, %285 : vector<8x256xf32>
    %287 = tpu.concatenate %268, %269, %272, %275, %276, %279, %282, %283, %286 in 0 : vector<8x256xf32>, vector<8x256xf32>, vector<8x256xf32>, vector<8x256xf32>, vector<8x256xf32>, vector<8x256xf32>, vector<8x256xf32>, vector<8x256xf32>, vector<8x256xf32> -> vector<72x256xf32>
    %288 = arith.truncf %287 : vector<72x256xf32> to vector<72x256xbf16>
    %cst_83 = arith.constant dense<0.000000e+00> : vector<4x256xf32>
    %289 = tpu.matmul %263, %288, %cst_83 {dimension_numbers = #tpu.dot_dimension_numbers<[1], [0], [0], [1], [0, 0, 1, 1], [], []>} : vector<4x72xbf16>, vector<72x256xbf16>, vector<4x256xf32> -> vector<4x256xf32>
    %c0_84 = arith.constant 0 : index
    %c0_85 = arith.constant 0 : index
    %290 = vector.load %arg22[%c0_84, %c0_85] : memref<4x1xf32, #tpu.memory_space<vmem>>, vector<4x1xf32>
    %c0_86 = arith.constant 0 : index
    %c0_87 = arith.constant 0 : index
    %291 = vector.load %arg23[%c0_86, %c0_87] : memref<4x1xf32, #tpu.memory_space<vmem>>, vector<4x1xf32>
    %cst_88 = arith.constant dense<0.000000e+00> : vector<4xf32>
    %292 = vector.multi_reduction <add>, %289, %cst_88 [1] : vector<4x256xf32> to vector<4xf32>
    %293 = vector.shape_cast %292 : vector<4xf32> to vector<4x1xf32>
    %cst_89 = arith.constant 3.906250e-03 : f32
    %294 = vector.broadcast %cst_89 : f32 to vector<4x1xf32>
    %295 = arith.mulf %293, %294 : vector<4x1xf32>
    %296 = arith.mulf %289, %289 : vector<4x256xf32>
    %cst_90 = arith.constant dense<0.000000e+00> : vector<4xf32>
    %297 = vector.multi_reduction <add>, %296, %cst_90 [1] : vector<4x256xf32> to vector<4xf32>
    %298 = vector.shape_cast %297 : vector<4xf32> to vector<4x1xf32>
    %cst_91 = arith.constant 3.906250e-03 : f32
    %299 = vector.broadcast %cst_91 : f32 to vector<4x1xf32>
    %300 = arith.mulf %298, %299 : vector<4x1xf32>
    %301 = arith.mulf %295, %295 : vector<4x1xf32>
    %302 = arith.subf %300, %301 : vector<4x1xf32>
    %cst_92 = arith.constant 0.000000e+00 : f32
    %303 = vector.broadcast %cst_92 : f32 to vector<4x1xf32>
    %304 = arith.maximumf %302, %303 : vector<4x1xf32>
    %cst_93 = arith.constant 9.99999974E-6 : f32
    %305 = vector.broadcast %cst_93 : f32 to vector<4x1xf32>
    %306 = arith.addf %304, %305 : vector<4x1xf32>
    %307 = math.rsqrt %306 : vector<4x1xf32>
    %308 = arith.mulf %290, %307 : vector<4x1xf32>
    %309 = arith.mulf %295, %308 : vector<4x1xf32>
    %310 = arith.subf %291, %309 : vector<4x1xf32>
    %311 = vector.broadcast %308 : vector<4x1xf32> to vector<4x256xf32>
    %312 = arith.mulf %289, %311 : vector<4x256xf32>
    %313 = vector.broadcast %310 : vector<4x1xf32> to vector<4x256xf32>
    %314 = arith.addf %312, %313 : vector<4x256xf32>
    %315 = math.tanh %314 : vector<4x256xf32>
    %c0_94 = arith.constant 0 : index
    %c0_95 = arith.constant 0 : index
    %c0_96 = arith.constant 0 : index
    %316 = vector.load %arg24[%c0_94, %c0_95, %c0_96] : memref<1x4x256xf32, #tpu.memory_space<vmem>>, vector<1x4x256xf32>
    %317 = vector.shape_cast %316 : vector<1x4x256xf32> to vector<4x256xf32>
    %318 = vector.shape_cast %315 : vector<4x256xf32> to vector<1x4x256xf32>
    tpu.vector_store %arg24[%c0_94, %c0_95, %c0_96], %318 {strides = array<i32>} : memref<1x4x256xf32, #tpu.memory_space<vmem>>, vector<1x4x256xf32>,
    return
  }
  func.func @transform_0(%arg0: i32) -> (i32, i32, i32) {
    %c0_i32 = arith.constant 0 : i32
    %c0_i32_0 = arith.constant 0 : i32
    %c0_i32_1 = arith.constant 0 : i32
    return %arg0, %c0_i32, %c0_i32_0 : i32, i32, i32
  }
  func.func @transform_1(%arg0: i32) -> (i32, i32) {
    %c0_i32 = arith.constant 0 : i32
    %c0_i32_0 = arith.constant 0 : i32
    %c0_i32_1 = arith.constant 0 : i32
    return %c0_i32, %c0_i32_0 : i32, i32
  }
  func.func @transform_2(%arg0: i32) -> (i32, i32) {
    %c0_i32 = arith.constant 0 : i32
    %c0_i32_0 = arith.constant 0 : i32
    %c0_i32_1 = arith.constant 0 : i32
    return %c0_i32, %c0_i32_0 : i32, i32
  }
  func.func @transform_3(%arg0: i32) -> (i32, i32) {
    %c0_i32 = arith.constant 0 : i32
    %c0_i32_0 = arith.constant 0 : i32
    %c0_i32_1 = arith.constant 0 : i32
    return %c0_i32, %c0_i32_0 : i32, i32
  }
  func.func @transform_4(%arg0: i32) -> (i32, i32) {
    %c0_i32 = arith.constant 0 : i32
    %c0_i32_0 = arith.constant 0 : i32
    %c0_i32_1 = arith.constant 0 : i32
    return %c0_i32, %c0_i32_0 : i32, i32
  }
  func.func @transform_5(%arg0: i32) -> (i32, i32) {
    %c0_i32 = arith.constant 0 : i32
    %c0_i32_0 = arith.constant 0 : i32
    %c0_i32_1 = arith.constant 0 : i32
    return %c0_i32, %c0_i32_0 : i32, i32
  }
  func.func @transform_6(%arg0: i32) -> (i32, i32) {
    %c0_i32 = arith.constant 0 : i32
    %c0_i32_0 = arith.constant 0 : i32
    %c0_i32_1 = arith.constant 0 : i32
    return %c0_i32, %c0_i32_0 : i32, i32
  }
  func.func @transform_7(%arg0: i32) -> (i32, i32) {
    %c0_i32 = arith.constant 0 : i32
    %c0_i32_0 = arith.constant 0 : i32
    %c0_i32_1 = arith.constant 0 : i32
    return %c0_i32, %c0_i32_0 : i32, i32
  }
  func.func @transform_8(%arg0: i32) -> (i32, i32) {
    %c0_i32 = arith.constant 0 : i32
    %c0_i32_0 = arith.constant 0 : i32
    %c0_i32_1 = arith.constant 0 : i32
    return %c0_i32, %c0_i32_0 : i32, i32
  }
  func.func @transform_9(%arg0: i32) -> (i32, i32) {
    %c0_i32 = arith.constant 0 : i32
    %c0_i32_0 = arith.constant 0 : i32
    %c0_i32_1 = arith.constant 0 : i32
    return %c0_i32, %c0_i32_0 : i32, i32
  }
  func.func @transform_10(%arg0: i32) -> (i32, i32) {
    %c0_i32 = arith.constant 0 : i32
    %c0_i32_0 = arith.constant 0 : i32
    %c0_i32_1 = arith.constant 0 : i32
    return %c0_i32, %c0_i32_0 : i32, i32
  }
  func.func @transform_11(%arg0: i32) -> (i32, i32) {
    %c0_i32 = arith.constant 0 : i32
    %c0_i32_0 = arith.constant 0 : i32
    %c0_i32_1 = arith.constant 0 : i32
    return %c0_i32, %c0_i32_0 : i32, i32
  }
  func.func @transform_12(%arg0: i32) -> (i32, i32) {
    %c0_i32 = arith.constant 0 : i32
    %c0_i32_0 = arith.constant 0 : i32
    %c0_i32_1 = arith.constant 0 : i32
    return %c0_i32, %c0_i32_0 : i32, i32
  }
  func.func @transform_13(%arg0: i32) -> (i32, i32) {
    %c0_i32 = arith.constant 0 : i32
    %c0_i32_0 = arith.constant 0 : i32
    %c0_i32_1 = arith.constant 0 : i32
    return %c0_i32, %c0_i32_0 : i32, i32
  }
  func.func @transform_14(%arg0: i32) -> (i32, i32) {
    %c0_i32 = arith.constant 0 : i32
    %c0_i32_0 = arith.constant 0 : i32
    %c0_i32_1 = arith.constant 0 : i32
    return %c0_i32, %c0_i32_0 : i32, i32
  }
  func.func @transform_15(%arg0: i32) -> (i32, i32) {
    %c0_i32 = arith.constant 0 : i32
    %c0_i32_0 = arith.constant 0 : i32
    %c0_i32_1 = arith.constant 0 : i32
    return %c0_i32, %c0_i32_0 : i32, i32
  }
  func.func @transform_16(%arg0: i32) -> (i32, i32) {
    %c0_i32 = arith.constant 0 : i32
    %c0_i32_0 = arith.constant 0 : i32
    %c0_i32_1 = arith.constant 0 : i32
    return %c0_i32, %c0_i32_0 : i32, i32
  }
  func.func @transform_17(%arg0: i32) -> (i32, i32) {
    %c0_i32 = arith.constant 0 : i32
    %c0_i32_0 = arith.constant 0 : i32
    %c0_i32_1 = arith.constant 0 : i32
    return %c0_i32, %c0_i32_0 : i32, i32
  }
  func.func @transform_18(%arg0: i32) -> (i32, i32) {
    %c0_i32 = arith.constant 0 : i32
    %c0_i32_0 = arith.constant 0 : i32
    %c0_i32_1 = arith.constant 0 : i32
    return %c0_i32, %c0_i32_0 : i32, i32
  }
  func.func @transform_19(%arg0: i32) -> (i32, i32) {
    %c0_i32 = arith.constant 0 : i32
    %c0_i32_0 = arith.constant 0 : i32
    %c0_i32_1 = arith.constant 0 : i32
    return %c0_i32, %c0_i32_0 : i32, i32
  }
  func.func @transform_20(%arg0: i32) -> (i32, i32) {
    %c0_i32 = arith.constant 0 : i32
    %c0_i32_0 = arith.constant 0 : i32
    %c0_i32_1 = arith.constant 0 : i32
    return %c0_i32, %c0_i32_0 : i32, i32
  }
  func.func @transform_21(%arg0: i32) -> (i32, i32) {
    %c0_i32 = arith.constant 0 : i32
    %c0_i32_0 = arith.constant 0 : i32
    %c0_i32_1 = arith.constant 0 : i32
    return %c0_i32, %c0_i32_0 : i32, i32
  }
  func.func @transform_22(%arg0: i32) -> (i32, i32) {
    %c0_i32 = arith.constant 0 : i32
    %c0_i32_0 = arith.constant 0 : i32
    %c0_i32_1 = arith.constant 0 : i32
    return %c0_i32, %c0_i32_0 : i32, i32
  }
  func.func @transform_23(%arg0: i32) -> (i32, i32, i32) {
    %c0_i32 = arith.constant 0 : i32
    %c0_i32_0 = arith.constant 0 : i32
    %c0_i32_1 = arith.constant 0 : i32
    return %arg0, %c0_i32, %c0_i32_0 : i32, i32, i32
  }
}

</mosaic_0001>

<bundles_post_ra>
// kernel: out_m_forward.1
= control target key start
LH: loop header
LB: loop body
LE: loop exit
PB: predicated region body
PF: predicated region fallthrough
CT: control target
= control target key end

     0   :  { %s3179_s0 = inlined_call_operand.vmem [shape: f32[2,4,256], index: 0, kind: input, shape index: {}]   ;;  %s3180_s1 = inlined_call_operand.vmem [shape: bf16[8,36], index: 1, kind: input, shape index: {}]   ;;  %s3181_s2 = inlined_call_operand.vmem [shape: f32[8,1], index: 2, kind: input, shape index: {}]   ;;  %s3182_s3 = inlined_call_operand.vmem [shape: f32[8,1], index: 3, kind: input, shape index: {}]   ;;  %s3183_s4 = inlined_call_operand.vmem [shape: f32[8,8], index: 4, kind: input, shape index: {}]   ;;  %s3184_s5 = inlined_call_operand.vmem [shape: f32[8,1], index: 5, kind: input, shape index: {}]   ;;  %s3185_s6 = inlined_call_operand.vmem [shape: f32[8,8], index: 6, kind: input, shape index: {}]   ;;  %s3186_s7 = inlined_call_operand.vmem [shape: f32[8,1], index: 7, kind: input, shape index: {}]   ;;  %s3187_s8 = inlined_call_operand.vmem [shape: bf16[8,72], index: 8, kind: input, shape index: {}]   ;;  %s3188_s9 = inlined_call_operand.vmem [shape: f32[8,1], index: 9, kind: input, shape index: {}]   ;;  %s3189_s10 = inlined_call_operand.vmem [shape: f32[8,1], index: 10, kind: input, shape index: {}]   ;;  %s3190_s11 = inlined_call_operand.vmem [shape: bf16[8,72], index: 11, kind: input, shape index: {}]   ;;  %s3191_s12 = inlined_call_operand.vmem [shape: f32[8,1], index: 12, kind: input, shape index: {}]   ;;  %s3192_s13 = inlined_call_operand.vmem [shape: f32[8,1], index: 13, kind: input, shape index: {}]   ;;  %s3193_s14 = inlined_call_operand.vmem [shape: bf16[8,72], index: 14, kind: input, shape index: {}]   ;;  %s3194_s15 = inlined_call_operand.vmem [shape: f32[8,1], index: 15, kind: input, shape index: {}]   ;;  %s3195_s16 = inlined_call_operand.vmem [shape: f32[8,8], index: 16, kind: input, shape index: {}]   ;;  %s3196_s17 = inlined_call_operand.vmem [shape: f32[8,1], index: 17, kind: input, shape index: {}]   ;;  %s3197_s18 = inlined_call_operand.vmem [shape: f32[8,8], index: 18, kind: input, shape index: {}]   ;;  %s3198_s19 = inlined_call_operand.vmem [shape: f32[8,1], index: 19, kind: input, shape index: {}]   ;;  %s3199_s20 = inlined_call_operand.vmem [shape: bf16[4,72], index: 20, kind: input, shape index: {}]   ;;  %s3200_s21 = inlined_call_operand.vmem [shape: f32[4,1], index: 21, kind: input, shape index: {}]   ;;  %s3201_s22 = inlined_call_operand.vmem [shape: f32[4,1], index: 22, kind: input, shape index: {}]   ;;  %s3202_s23 = inlined_call_operand.vmem [shape: f32[2,4,256], index: 23, kind: output, shape index: {}]  }
   0x1   :  { %3216 = sst [smem:[#allocation2_spill]] %s3179_s0 }
   0x2   :  { %3217 = sst [smem:[#allocation3_spill]] %s3180_s1 }
   0x3   :  { %3218 = sst [smem:[#allocation4_spill]] %s3181_s2 }
   0x4   :  { %3219 = sst [smem:[#allocation5_spill]] %s3182_s3 }
   0x5   :  { %3220 = sst [smem:[#allocation6_spill]] %s3183_s4  ;;  %s2624_s4 = smov 0  }
   0x6   :  { %3221 = sst [smem:[#allocation7_spill]] %s3184_s5 }
   0x7   :  { %3222 = sst [smem:[#allocation8_spill]] %s3185_s6 }
   0x8   :  { %3223 = sst [smem:[#allocation9_spill]] %s3186_s7 }
   0x9 LB: > { %s2149_s30 = sadd.s32 4294967295, %s2485_s4   ;;  %p2153_p0 = scmp.ge.s32.totalorder %s2485_s4, 1  ;;  %s2485_s4 = sphi %s2624_s4, %s33_s4  }
   0xa   : > { %p637_p1 = scmp.lt.s32.totalorder %s2485_s4, 3 }
   0xc   : > { %p638_p2 = pnand %p2153_p0, %p637_p1 }
   0xd   : > { %p701_p3 = scmp.lt.s32.totalorder (!%p638_p2), %s2149_s30, 1  ;;  %s3224_s1 = sld [smem:[#allocation2_spill]] (!%p638_p2) }
   0xe   : > { %641 = sbr.rel (%p638_p2) target bundleno = 3695 (0xe6f), region = 112  ;;  %s2488_s2 = smov (!%p638_p2), 34  }
   0xf   : > { %s2489_s6 = smov (!%p638_p2), 32   ;;  %s2490_s27 = smov (!%p638_p2), 17  }
  0x10   : > { %s2491_s7 = smov (!%p638_p2), 18   ;;  %s2492_s28 = smov (!%p638_p2), 16  }
  0x11   : > { %s2493_s29 = smov (!%p638_p2), 2   ;;  %s2494_s3 = smov (!%p638_p2), 111  }
  0x12   : > { %s2495_s0 = smov (!%p638_p2), 94   ;;  %s3212_s25 = smov (!%p638_p2), 96  }
  0x13   : > { %v712_v0 = vlaneseq  ;;  %s3243_s30 = smov (!%p701_p3, %s2149_s30), 1  ;;  %v2487_v6 = vmov 0.0   ;;  %vm761_vm4 = vcmask 138240   ;;  %vm826_vm5 = vcmask 277504   ;;  %s2497_s5 = smov 95  }
  0x14   : > { %s3203_s24 = sshll.u32 %s3243_s30, 3  ;;  %vm814_vm6 = vcmask 261120   ;;  %vm802_vm7 = vcmask 146432   ;;  %vm790_vm8 = vcmask 130048   ;;  %vm776_vm9 = vcmask 15360  }
  0x15   : > { %v713_v1 = vand.u32 127, %v712_v0  ;;  %s705_s26 = scalar_lea.vmem %s3224_s1, %s3203_s24  ;;  %s3204_s1 = smov 127   ;;  %vm943_vm10 = vcmask 769024   ;;  %vm967_vm11 = vcmask 1041408   ;;  %vm887_vm12 = vcmask 908288  }
  0x16   : > { %v751_v5 = vld [vmem:[%s705_s26] sm:$0xff]  ;;  %s3210_s26 = smov 110   ;;  %vm904_vm13 = vcmask 900096   ;;  %vm918_vm14 = vcmask 785408   ;;  %vm929_vm15 = vcmask 777216   ;;  %s3236_s24 = smov 127  }
  0x17   : > { %v714_v2 = vadd.s32 128, %v713_v1  ;;  %v719_v3 = vand.u32 15, %v713_v1  ;;  %754 = vst [vmem:[#allocation1] ss:$2 sm:$0xff] %v751_v5 }
  0x19   : > { %v726_v4 = vand.u32 15, %v714_v2  ;;  %vm739_vm0 = vcmp.ge.s32.totalorder %v719_v3, 1  ;;  %vm745_vm1 = vcmp.le.s32.totalorder %v719_v3, 14 }
  0x1a   : > { %v2640_v7 = vsel %vm739_vm0, 1.0, %v2487_v6  ;;  %v2160_v8 = vsel %vm745_vm1, 1.0, %v2487_v6  ;;  %vm948_vm0 = vcmask 1043456   ;;  %vm3215_vm1 = vcmask 1039360  }
  0x1b   : > { %vm746_vm2 = vcmp.le.s32.totalorder %v726_v4, 14  ;;  %vm740_vm3 = vcmp.ge.s32.totalorder %v726_v4, 1 }
  0x1c   : > { %v2161_v9 = vsel %vm746_vm2, 1.0, %v2487_v6  ;;  %v2642_v10 = vsel %vm740_vm3, 1.0, %v2487_v6  ;;  %vm876_vm2 = vcmask 916480   ;;  %vm859_vm3 = vcmask 1031168  }
  0x1d   : > { %v2209_v11 = vpack.i.bf16 %v2161_v9, %v2160_v8  ;;  %v2219_v12 = vpack.i.bf16 %v2642_v10, %v2640_v7 }
  0x1e   : > { %v755_v13 = vld.sshfl [vmem:[#allocation1] sm:$0xff pattern:$0x75316420]  ;;  %v756_v14 = vld.sshfl [vmem:[#allocation1 + $0x8] sm:$0xff pattern:$0x75316420] }
  0x1f   : > { %2210 = vrot.lane.b32.xlu1 %v2209_v11, %s2488_s2  ;;  %2220 = vrot.lane.b32.xlu2 %v2219_v12, %s2489_s6  ;;  %s3208_s2 = smov 126   ;;  %s3206_s6 = smov 112  }
  0x20   : > { %757 = vrot.lane.b32.xlu0 %v755_v13, %s2490_s27 }
  0x27   : > { %2215 = vrot.lane.b32.xlu1 %v2209_v11, %s2491_s7  ;;  %2225 = vrot.lane.b32.xlu2 %v2219_v12, %s2492_s28  ;;  %s3233_s7 = smov 110   ;;  %s3234_s28 = smov 126  }
  0x28   : > { %759 = vrot.lane.b32.xlu0 %v756_v14, %s2490_s27 }
  0x30   : > { %2230 = vrot.lane.b32.xlu0 %v2209_v11, %s2493_s29  ;;  %s3225_s29 = sld [smem:[#allocation3_spill]] }
  0x79   : > { %v2221_v26 = vpop.permute.xlu2 %2220 }
  0x7a   : > { %v2675_v28 = vunpack.i.h.bf16 %v2221_v26  ;;  %v2680_v31 = vunpack.i.l.bf16 %v2221_v26 }
  0x7c   : > { %v2685_v35 = vsel %vm814_vm6, %v2680_v31, %v2675_v28 }
  0x81   : > { %v2226_v44 = vpop.permute.xlu2 %2225 }
  0x82   : > { %v2708_v48 = vunpack.i.h.bf16 %v2226_v44  ;;  %v2714_v50 = vunpack.i.l.bf16 %v2226_v44 }
  0x84   : > { %v2724_v55 = vsel %vm790_vm8, %v2714_v50, %v2708_v48 }
  0x91   : > { %v2211_v16 = vpop.permute.xlu1 %2210 }
  0x92   : > { %v758_v15 = vpop.permute.xlu0 %757  ;;  %v2648_v17 = vunpack.i.h.bf16 %v2211_v16  ;;  %v2650_v18 = vunpack.i.l.bf16 %v2211_v16 }
  0x93   : > { %v2653_v20 = vsel %vm761_vm4, 0.0, %v758_v15 }
  0x94   : > { %v2663_v23 = vsel %vm826_vm5, %v2650_v18, %v2648_v17  ;;  %v831_v29 = vmul.f32 %v2650_v18, %v2653_v20  ;;  %v836_v34 = vrot.slane %v2653_v20, 4  ;;  %v819_v41 = vmul.f32 %v2680_v31, %v2653_v20 }
  0x95   : > { %v795_v63 = vmul.f32 %v2714_v50, %v2653_v20  ;;  %vm963_vm5 = vcmask 293888  }
  0x97   : > { %v867_v2 = vrot.slane %v795_v63, 4 }
  0x99   : > { %v2216_v32 = vpop.permute.xlu1 %2215 }
  0x9a   : > { %v760_v19 = vpop.permute.xlu0 %759  ;;  %v2690_v38 = vunpack.i.h.bf16 %v2216_v32  ;;  %v2692_v39 = vunpack.i.l.bf16 %v2216_v32 }
  0x9b   : > { %v2656_v21 = vsel %vm761_vm4, %v758_v15, %v760_v19  ;;  %v2659_v22 = vsel %vm761_vm4, %v760_v19, 0.0 }
  0x9c   : > { %885 = vrot.lane.b32.xlu1 %v2659_v22, %s2494_s3  ;;  %v833_v24 = vmul.f32 %v2648_v17, %v2659_v22  ;;  %v2234_v25 = vpack.i.bf16 %v2656_v21, %v2653_v20  ;;  %v832_v27 = vmul.f32 %v2663_v23, %v2656_v21  ;;  %v837_v30 = vrot.slane %v2656_v21, 4 }
  0x9d   : > { %v821_v36 = vmul.f32 %v2675_v28, %v2659_v22  ;;  %v820_v40 = vmul.f32 %v2685_v35, %v2656_v21  ;;  %v2702_v42 = vsel %vm802_vm7, %v2692_v39, %v2690_v38  ;;  %v838_v46 = vrot.slane %v2659_v22, 4 }
  0x9e   : > { %941 = vrot.lane.b32.xlu2 %v833_v24, %s2495_s0  ;;  %2235 = vrot.lane.b32.xlu0 %v2234_v25, %s2494_s3  ;;  %v2239_v33 = vpack.i.bf16 %v832_v27, %v831_v29  ;;  %v2249_v37 = vpack.i.bf16 %v837_v30, %v836_v34  ;;  %v808_v47 = vmul.f32 %v2702_v42, %v2656_v21 }
  0x9f   : > { %v2244_v43 = vpack.i.bf16 %v820_v40, %v819_v41  ;;  %v807_v49 = vmul.f32 %v2692_v39, %v2653_v20  ;;  %v809_v53 = vmul.f32 %v2690_v38, %v2659_v22  ;;  %v796_v60 = vmul.f32 %v2724_v55, %v2656_v21 }
  0xa0   : > { %v896_v54 = vrot.slane %v808_v47, 4  ;;  %v797_v5 = vmul.f32 %v2708_v48, %v2659_v22 }
  0xa1   : > { %v895_v56 = vrot.slane %v807_v49, 4  ;;  %v897_v58 = vrot.slane %v809_v53, 4  ;;  %v868_v0 = vrot.slane %v796_v60, 4 }
  0xa2   : > { %v2231_v45 = vpop.permute.xlu0 %2230  ;;  %v869_v6 = vrot.slane %v797_v5, 4 }
  0xa3   : > { %v2716_v51 = vunpack.i.h.bf16 %v2231_v45  ;;  %v2718_v52 = vunpack.i.l.bf16 %v2231_v45  ;;  %v2264_v59 = vpack.i.bf16 %v896_v54, %v895_v56  ;;  %v2269_v3 = vpack.i.bf16 %v868_v0, %v867_v2 }
  0xa4   : > { %2240 = vrot.lane.b32.xlu1 %v2239_v33, %s2495_s0 }
  0xa5   : > { %v2728_v57 = vsel %vm776_vm9, %v2718_v52, %v2716_v51  ;;  %v781_v61 = vmul.f32 %v2718_v52, %v2653_v20  ;;  %v783_v4 = vmul.f32 %v2716_v51, %v2659_v22 }
  0xa6   : > { %916 = vrot.lane.b32.xlu2 %v821_v36, %s3212_s25  ;;  %2250 = vrot.lane.b32.xlu0 %v2249_v37, %s2497_s5  ;;  %v782_v62 = vmul.f32 %v2728_v57, %v2656_v21 }
  0xa8   : > { %v2259_v1 = vpack.i.bf16 %v782_v62, %v781_v61 }
  0xac   : > { %2245 = vrot.lane.b32.xlu1 %v2244_v43, %s3212_s25  ;;  %s3230_s25 = sld [smem:[#allocation8_spill]] }
  0xae   : > { %2255 = vrot.lane.b32.xlu2 %v2249_v37, %s3204_s1  ;;  %843 = vrot.lane.b32.xlu0 %v838_v46, %s3204_s1 }
  0xb4   : > { %927 = vrot.lane.b32.xlu1 %v838_v46, %s2497_s5 }
  0xb6   : > { %902 = vrot.lane.b32.xlu0 %v897_v58, %s3210_s26  ;;  %2265 = vrot.lane.b32.xlu2 %v2264_v59, %s3210_s26 }
  0xbc   : > { %2260 = vrot.lane.b32.xlu1 %v2259_v1, %s3208_s2 }
  0xbe   : > { %2270 = vrot.lane.b32.xlu0 %v2269_v3, %s3206_s6  ;;  %857 = vrot.lane.b32.xlu2 %v783_v4, %s3208_s2  ;;  %s3232_s2 = smov 96  }
  0xc4   : > { %874 = vrot.lane.b32.xlu1 %v869_v6, %s3206_s6  ;;  %s3227_s6 = sld [smem:[#allocation5_spill]] }
  0xf8   : > { %v942_v8 = vpop.permute.xlu2 %941 }
 0x100   : > { %v917_v9 = vpop.permute.xlu2 %916 }
 0x108   : > { %v2749_v11 = vpop.permute.xlu2 %2255 }
 0x109   : > { %v2258_v4 = vunpack.i.h.bf16 %v2749_v11  ;;  %v2257_v5 = vunpack.i.l.bf16 %v2749_v11 }
 0x10e   : > { %v886_v12 = vpop.permute.xlu1 %885 }
 0x110   : > { %v2236_v13 = vpop.permute.xlu0 %2235  ;;  %v2266_v19 = vpop.permute.xlu2 %2265 }
 0x111   : > { %v2268_v29 = vunpack.i.h.bf16 %v2266_v19  ;;  %v2267_v30 = vunpack.i.l.bf16 %v2266_v19  ;;  %v2238_v32 = vunpack.i.h.bf16 %v2236_v13  ;;  %v2237_v33 = vunpack.i.l.bf16 %v2236_v13 }
 0x113   : > { %v888_v45 = vsel %vm887_vm12, %v2237_v33, %v2238_v32  ;;  %v905_v46 = vsel %vm904_vm13, %v2267_v30, %v2268_v29  ;;  %v889_v63 = vsel %vm887_vm12, %v2238_v32, %v886_v12  ;;  %v769_v30 = vmul.f32 %v2642_v10, %v2656_v21 }
 0x114   : > { %v953_v54 = vsel %vm948_vm0, %v888_v45, %v905_v46 }
 0x116   : > { %v2241_v14 = vpop.permute.xlu1 %2240 }
 0x117   : > { %v2243_v15 = vunpack.i.h.bf16 %v2241_v14  ;;  %v2242_v16 = vunpack.i.l.bf16 %v2241_v14 }
 0x118   : > { %v2251_v24 = vpop.permute.xlu0 %2250 }
 0x119   : > { %v944_v25 = vsel %vm943_vm10, %v2242_v16, %v2243_v15  ;;  %v945_v22 = vsel %vm943_vm10, %v2243_v15, %v942_v8  ;;  %v2253_v37 = vunpack.i.h.bf16 %v2251_v24  ;;  %v2252_v40 = vunpack.i.l.bf16 %v2251_v24 }
 0x11a   : > { %v961_v26 = vpack.c.bf16 %v944_v25, %v944_v25  ;;  %v962_v27 = vpack.c.bf16 %v945_v22, %v945_v22  ;;  %v768_v16 = vmul.f32 %v2640_v7, %v2653_v20  ;;  %v752_v20 = vld [vmem:[%s3225_s29] sm:$0xf]  ;;  %s3226_s29 = sld [smem:[#allocation4_spill]] }
 0x11b   : > { %v930_v53 = vsel %vm929_vm15, %v2252_v40, %v2253_v37 }
 0x11c   : > { %v969_v34 = vsel %vm967_vm11, %v961_v26, 0  ;;  %v972_v36 = vsel %vm967_vm11, %v962_v27, 0  ;;  %v858_v27 = vpop.permute.xlu2 %857  ;;  %vm1060_vm11 = vcmask 64512  }
 0x11d   : > { %979 = vmatpush.bf16.msra.mxu0 %v969_v34  ;;  %992 = vmatpush.bf16.msra.mxu1 %v972_v36 }
 0x11e   : > { %v2246_v41 = vpop.permute.xlu1 %2245 }
 0x11f   : > { %v2248_v43 = vunpack.i.h.bf16 %v2246_v41  ;;  %v2247_v44 = vunpack.i.l.bf16 %v2246_v41 }
 0x120   : > { %v844_v47 = vpop.permute.xlu0 %843 }
 0x121   : > { %v919_v49 = vsel %vm918_vm14, %v2247_v44, %v2248_v43  ;;  %v920_v0 = vsel %vm918_vm14, %v2248_v43, %v917_v9  ;;  %v846_v9 = vsel %vm3215_vm1, %v2257_v5, %v2258_v4  ;;  %v847_v22 = vsel %vm3215_vm1, %v2258_v4, %v844_v47  ;;  %v1000_v4 = vld [vmem:[%s3226_s29] sm:$0xff]  ;;  %s3229_s29 = sld [smem:[#allocation7_spill]] }
 0x122   : > { %v955_v56 = vsel %vm948_vm0, %v919_v49, %v930_v53  ;;  %v949_v11 = vsel %vm948_vm0, %v768_v16, %v846_v9  ;;  %v950_v34 = vsel %vm948_vm0, %v769_v30, %v847_v22  ;;  %v2502_v49 = vmov 0  }
 0x123   : > { %v959_v58 = vpack.c.bf16 %v955_v56, %v953_v54  ;;  %2274 = vset.pattern.permute.xlu1 %v2502_v49  ;;  %2275 = vset.pattern.permute.xlu2 %v2502_v49 }
 0x124   : > { %2356 = vset.pattern.permute.xlu0 %v2502_v49 }
 0x125   : > { %980 = vmatpush.bf16.msra.mxu0 %v959_v58 }
 0x126   : > { %v928_v59 = vpop.permute.xlu1 %927 }
 0x127   : > { %v931_v60 = vsel %vm929_vm15, %v2253_v37, %v928_v59 }
 0x128   : > { %v903_v61 = vpop.permute.xlu0 %902  ;;  %v956_v2 = vsel %vm948_vm0, %v920_v0, %v931_v60 }
 0x129   : > { %v906_v62 = vsel %vm904_vm13, %v2268_v29, %v903_v61 }
 0x12a   : > { %v954_v1 = vsel %vm948_vm0, %v889_v63, %v906_v62 }
 0x12b   : > { %v960_v3 = vpack.c.bf16 %v956_v2, %v954_v1 }
 0x12d   : > { %993 = vmatpush.bf16.msra.mxu1 %v960_v3 }
 0x12e   : > { %v2261_v6 = vpop.permute.xlu1 %2260 }
 0x12f   : > { %v2263_v8 = vunpack.i.h.bf16 %v2261_v6  ;;  %v2262_v13 = vunpack.i.l.bf16 %v2261_v6 }
 0x130   : > { %v2271_v14 = vpop.permute.xlu0 %2270 }
 0x131   : > { %v2273_v12 = vunpack.i.h.bf16 %v2271_v14  ;;  %v2272_v15 = vunpack.i.l.bf16 %v2271_v14  ;;  %v860_v19 = vsel %vm859_vm3, %v2262_v13, %v2263_v8  ;;  %v861_v33 = vsel %vm859_vm3, %v2263_v8, %v858_v27  ;;  %v1001_v14 = vld [vmem:[%s3227_s6] sm:$0xff]  ;;  %s3228_s6 = sld [smem:[#allocation6_spill]] }
 0x132   : > { %v2503_v27 = vmov 256.0  }
 0x133   : > { %v877_v24 = vsel %vm876_vm2, %v2272_v15, %v2273_v12 }
 0x134   : > { %v951_v25 = vsel %vm948_vm0, %v860_v19, %v877_v24 }
 0x135   : > { %v957_v26 = vpack.c.bf16 %v951_v25, %v949_v11 }
 0x136   : > { %v875_v29 = vpop.permute.xlu1 %874 }
 0x137   : > { %v878_v32 = vsel %vm876_vm2, %v2273_v12, %v875_v29  ;;  %981 = vmatpush.bf16.msra.mxu0 %v957_v26 }
 0x138   : > { %v952_v36 = vsel %vm948_vm0, %v861_v33, %v878_v32 }
 0x139   : > { %v958_v37 = vpack.c.bf16 %v952_v36, %v950_v34 }
 0x13a   : > { %2162 = vmatmul.msk.bf16.vlgmr.msra.gmra.mxu0 %vm963_vm5, %v752_v20 }
 0x13b   : > { %994 = vmatpush.bf16.msra.mxu1 %v958_v37 }
 0x13e   : > { %2163 = vmatmul.msk.bf16.vlgmr.msra.gmra.mxu1 %vm963_vm5, %v752_v20 }
 0x1b7   : > { %v983_v40 = vpop.f32.mrf.mxu0 }
 0x1b8   : > { %v1006_v21 = vmul.f32 %v983_v40, %v983_v40 }
 0x1bb   : > { %v996_v41 = vpop.f32.mrf.mxu1 }
 0x1bc   : > { %v1002_v43 = vadd.f32 %v996_v41, %v983_v40  ;;  %v1007_v44 = vmul.f32 %v996_v41, %v996_v41 }
 0x1be   : > { %1003 = vadd.xlane.f32.xlu2 %v1002_v43  ;;  %v1008_v45 = vadd.f32 %v1007_v44, %v1006_v21  ;;  %v1057_v21 = vld [vmem:[%s3229_s29] sm:$0xff]  ;;  %s3235_s29 = smov 112  }
 0x1bf   : > { %v985_v46 = vpop.f32.mrf.mxu0 }
 0x1c0   : > { %1009 = vadd.xlane.f32.xlu0 %v1008_v45  ;;  %v1058_v45 = vld [vmem:[%s3230_s25] sm:$0xff] }
 0x1c3   : > { %v998_v47 = vpop.f32.mrf.mxu1 }
 0x231   : > { %v1004_v53 = vpop.xlane.xlu2 %1003 }
 0x232   : > { %v1005_v54 = vmul.f32 0.00390625, %v1004_v53 }
 0x233   : > { %v1010_v56 = vpop.xlane.xlu0 %1009 }
 0x234   : > { %v1012_v58 = vmul.f32 %v1005_v54, %v1005_v54  ;;  %v1011_v59 = vmul.f32 0.00390625, %v1010_v56 }
 0x236   : > { %v1013_v60 = vsub.f32 %v1011_v59, %v1012_v58 }
 0x238   : > { %v1014_v61 = vmax.f32 %v1013_v60, 0.0 }
 0x23a   : > { %v1015_v62 = vadd.f32 1e-05, %v1014_v61 }
 0x23c   : > { %2437 = vrsqrt.f32 %v1015_v62  ;;  %vm1022_vm7 = vweird.f32 %v1015_v62 }
 0x242   : > { %v2438_v63 = vpop.eup %2437 }
 0x243   : > { %v1017_v0 = vmul.f32 %v2438_v63, %v1015_v62  ;;  %vm1023_vm6 = vweird.f32 %v2438_v63 }
 0x244   : > { %vm1024_vm8 = vmor %vm1022_vm7, %vm1023_vm6 }
 0x245   : > { %v1018_v1 = vmul.f32 %v2438_v63, %v1017_v0 }
 0x247   : > { %v1019_v2 = vmul.f32 0.5, %v1018_v1 }
 0x249   : > { %v1020_v3 = vsub.f32 1.5, %v1019_v2 }
 0x24b   : > { %v1021_v5 = vmul.f32 %v2438_v63, %v1020_v3 }
 0x24d   : > { %v1025_v6 = vsel %vm1024_vm8, %v2438_v63, %v1021_v5 }
 0x24e   : > { %v1026_v8 = vmul.f32 %v1025_v6, %v1000_v4 }
 0x250   : > { %1031 = vperm.xlu1 %2274, %v1026_v8   ;;  %v1027_v13 = vmul.f32 %v1026_v8, %v1005_v54 }
 0x252   : > { %v1028_v12 = vsub.f32 %v1001_v14, %v1027_v13  ;;  %v1135_v13 = vld [vmem:[%s3195_s16] sm:$0xff] }
 0x258   : > { %1038 = vperm.xlu1 %2274, %v1028_v12  }
 0x2c2   : > { %v1032_v15 = vpop.permute.xlu1 %1031 }
 0x2c3   : > { %v1034_v9 = vmul.f32 %v1032_v15, %v983_v40  ;;  %v1035_v16 = vmul.f32 %v1032_v15, %v996_v41  ;;  %v1056_v40 = vld [vmem:[%s3228_s6] sm:$0xff]  ;;  %s3231_s6 = sld [smem:[#allocation9_spill]] }
 0x2c9   : > { %v1059_v46 = vld [vmem:[%s3231_s6] sm:$0xff] }
 0x2ca   : > { %v1039_v19 = vpop.permute.xlu1 %1038 }
 0x2cb   : > { %v1041_v24 = vadd.f32 %v1039_v19, %v1034_v9  ;;  %v1042_v11 = vadd.f32 %v1039_v19, %v1035_v16 }
 0x2cd   : > { %2439 = vtanh.f32 %v1041_v24 }
 0x2ce   : > { %2441 = vtanh.f32 %v1042_v11 }
 0x2cf   : > { %2443 = vrcp.f32 %v2503_v27 }
 0x2d3   : > { %v2440_v25 = vpop.eup %2439 }
 0x2d4   : > { %v2442_v22 = vpop.eup %2441 }
 0x2d5   : > { %v1045_v26 = vadd.f32 %v2442_v22, %v2440_v25  ;;  %v2444_v29 = vpop.eup %2443 }
 0x2d6   : > { %v1049_v30 = vmul.f32 256.0, %v2444_v29  ;;  %vm1053_vm9 = vweird.f32 %v2444_v29 }
 0x2d7   : > { %1046 = vadd.xlane.f32.xlu1 %v1045_v26 }
 0x2d8   : > { %v1050_v32 = vsub.f32 1.0, %v1049_v30 }
 0x2da   : > { %v1051_v20 = vmul.f32 %v2444_v29, %v1050_v32 }
 0x2dc   : > { %v1052_v33 = vadd.f32 %v2444_v29, %v1051_v20 }
 0x2de   : > { %v1054_v34 = vsel %vm1053_vm9, %v2444_v29, %v1052_v33  ;;  %vm3214_vm9 = vcmask 588800  }
 0x34a   : > { %v1047_v36 = vpop.xlane.xlu1 %1046 }
 0x34b   : > { %v1055_v37 = vmul.f32 %v1054_v34, %v1047_v36 }
 0x34d   : > { %1079 = vmatpush.msra.mxu2 %v1055_v37 }
 0x34e   : > { %2164 = vmatmul.msk.f32.vlgmr.msra.gmra.mxu2 %vm1060_vm11, %v1056_v40 }
 0x3d1   : > { %v1081_v41 = vpop.f32.mrf.mxu2 }
 0x3d2   : > { %v1082_v43 = vadd.f32 %v1081_v41, %v1057_v21 }
 0x3d4   : > { %v1084_v44 = vmax.f32 %v1082_v43, 0.0 }
 0x3d6   : > { %1103 = vmatpush.msra.mxu3 %v1084_v44 }
 0x3d7   : > { %2165 = vmatmul.msk.f32.vlgmr.msra.gmra.mxu3 %vm1060_vm11, %v1058_v45 }
 0x45a   : > { %v1105_v47 = vpop.f32.mrf.mxu3 }
 0x45b   : > { %v1106_v49 = vadd.f32 %v1105_v47, %v1059_v46  ;;  %v1136_v46 = vld [vmem:[%s3196_s17] sm:$0xff] }
 0x45d   : > { %v2166_v53 = vmul.f32 -1.442695, %v1106_v49 }
 0x45f   : > { %2445 = vpow2.f32 %v2166_v53 }
 0x465   : > { %v2446_v54 = vpop.eup %2445 }
 0x466   : > { %v1111_v56 = vadd.f32 1.0, %v2446_v54 }
 0x468   : > { %2447 = vrcp.f32 %v1111_v56  ;;  %v1123_v61 = vand.u32 2147483648, %v1111_v56  ;;  %v1121_v63 = vand.u32 2147483647, %v1111_v56  ;;  %vm1117_vm6 = vweird.f32 %v1111_v56 }
 0x46a   : > { %v1124_v1 = vor.u32 1.1754944e-38, %v1123_v61  ;;  %vm1122_vm8 = vcmp.eq.f32.partialorder %v1121_v63, 8.507059e+37 }
 0x46e   : > { %v2448_v58 = vpop.eup %2447 }
 0x46f   : > { %v1113_v59 = vmul.f32 %v2448_v58, %v1111_v56  ;;  %vm1118_vm5 = vweird.f32 %v2448_v58 }
 0x470   : > { %vm1119_vm7 = vmor %vm1117_vm6, %vm1118_vm5 }
 0x471   : > { %v1114_v60 = vsub.f32 1.0, %v1113_v59 }
 0x473   : > { %v1115_v62 = vmul.f32 %v2448_v58, %v1114_v60 }
 0x475   : > { %v1116_v0 = vadd.f32 %v2448_v58, %v1115_v62 }
 0x477   : > { %v1120_v2 = vsel %vm1119_vm7, %v2448_v58, %v1116_v0  ;;  %v1137_v58 = vld [vmem:[%s3197_s18] sm:$0xff] }
 0x478   : > { %v1125_v3 = vsel %vm1122_vm8, %v1124_v1, %v1120_v2 }
 0x479   : > { %1129 = vperm.xlu2 %2275, %v1125_v3   ;;  %v1134_v4 = vmul.f32 %v1125_v3, %v1055_v37 }
 0x47b   : > { %1157 = vmatpush.msrb.mxu2 %v1134_v4 }
 0x47c   : > { %2167 = vmatmul.msk.f32.vlgmr.msrb.gmra.mxu2 %vm1060_vm11, %v1135_v13 }
 0x4d3   : > { %v1130_v5 = vpop.permute.xlu2 %1129 }
 0x4d4   : > { %v2804_v6 = vmul.f32 %v2440_v25, %v1130_v5  ;;  %v2806_v8 = vmul.f32 %v2442_v22, %v1130_v5 }
 0x4d6   : > { %1210 = vrot.lane.b32.xlu2 %v2806_v8, %s2490_s27  ;;  %1208 = vrot.lane.b32.xlu0 %v2804_v6, %s2490_s27 }
 0x4ff   : > { %v1159_v47 = vpop.f32.mrf.mxu2 }
 0x500   : > { %v1160_v49 = vadd.f32 %v1159_v47, %v1136_v46 }
 0x502   : > { %v1162_v54 = vmax.f32 %v1160_v49, 0.0 }
 0x504   : > { %1181 = vmatpush.msrb.mxu3 %v1162_v54 }
 0x505   : > { %2168 = vmatmul.msk.f32.vlgmr.msrb.gmra.mxu3 %vm1060_vm11, %v1137_v58 }
 0x530   : > { %v1211_v14 = vpop.permute.xlu2 %1210 }
 0x531   : > { %v1217_v12 = vsel %vm761_vm4, %v1211_v14, 0.0 }
 0x532   : > { %1277 = vrot.lane.b32.xlu1 %v1217_v12, %s2494_s3  ;;  %1313 = vrot.lane.b32.xlu0 %v1217_v12, %s2497_s5  ;;  %v1234_v15 = vmul.f32 %v2648_v17, %v1217_v12  ;;  %v1231_v9 = vmul.f32 %v2675_v28, %v1217_v12  ;;  %v1222_v34 = vmul.f32 %v2716_v51, %v1217_v12 }
 0x533   : > { %v1225_v21 = vmul.f32 %v2708_v48, %v1217_v12  ;;  %v1228_v41 = vmul.f32 %v2690_v38, %v1217_v12 }
 0x53a   : > { %1326 = vrot.lane.b32.xlu0 %v1234_v15, %s2495_s0 }
 0x542   : > { %1303 = vrot.lane.b32.xlu0 %v1231_v9, %s3232_s2 }
 0x548   : > { %v1209_v16 = vpop.permute.xlu0 %1208 }
 0x549   : > { %v2824_v19 = vsel %vm761_vm4, %v1209_v16, %v1211_v14  ;;  %v2827_v24 = vsel %vm761_vm4, 0.0, %v1209_v16 }
 0x54a   : > { %v2276_v11 = vpack.i.bf16 %v2824_v19, %v2827_v24  ;;  %v1232_v25 = vmul.f32 %v2650_v18, %v2827_v24  ;;  %v1233_v22 = vmul.f32 %v2824_v19, %v2663_v23  ;;  %v1226_v26 = vmul.f32 %v2692_v39, %v2827_v24 }
 0x54b   : > { %v1227_v27 = vmul.f32 %v2824_v19, %v2702_v42  ;;  %v1220_v32 = vmul.f32 %v2718_v52, %v2827_v24  ;;  %v1221_v20 = vmul.f32 %v2824_v19, %v2728_v57  ;;  %v1229_v36 = vmul.f32 %v2680_v31, %v2827_v24 }
 0x54c   : > { %2277 = vrot.lane.b32.xlu2 %v2276_v11, %s2497_s5  ;;  %v2286_v29 = vpack.i.bf16 %v1233_v22, %v1232_v25  ;;  %v1230_v37 = vmul.f32 %v2824_v19, %v2685_v35  ;;  %v1223_v43 = vmul.f32 %v2714_v50, %v2827_v24  ;;  %v1224_v44 = vmul.f32 %v2824_v19, %v2724_v55 }
 0x54d   : > { %v2296_v30 = vpack.i.bf16 %v1227_v27, %v1226_v26  ;;  %v2301_v33 = vpack.i.bf16 %v1221_v20, %v1220_v32 }
 0x54e   : > { %2287 = vrot.lane.b32.xlu1 %v2286_v29, %s2495_s0  ;;  %v2291_v40 = vpack.i.bf16 %v1230_v37, %v1229_v36  ;;  %v2306_v45 = vpack.i.bf16 %v1224_v44, %v1223_v43 }
 0x54f   : > { %2297 = vrot.lane.b32.xlu0 %v2296_v30, %s3233_s7 }
 0x554   : > { %2282 = vrot.lane.b32.xlu2 %v2276_v11, %s2494_s3 }
 0x556   : > { %2302 = vrot.lane.b32.xlu1 %v2301_v33, %s3234_s28 }
 0x557   : > { %1254 = vrot.lane.b32.xlu0 %v1222_v34, %s3234_s28 }
 0x55c   : > { %2292 = vrot.lane.b32.xlu2 %v2291_v40, %s3232_s2 }
 0x55e   : > { %1267 = vrot.lane.b32.xlu1 %v1225_v21, %s3235_s29 }
 0x55f   : > { %2312 = vrot.lane.b32.xlu0 %v2276_v11, %s3236_s24 }
 0x564   : > { %1290 = vrot.lane.b32.xlu2 %v1228_v41, %s3233_s7 }
 0x56c   : > { %2307 = vrot.lane.b32.xlu2 %v2306_v45, %s3235_s29 }
 0x574   : > { %1241 = vrot.lane.b32.xlu2 %v1217_v12, %s3236_s24 }
 0x5a4   : > { %v1314_v53 = vpop.permute.xlu0 %1313  ;;  %v1278_v62 = vpop.permute.xlu1 %1277 }
 0x5a6   : > { %v2278_v56 = vpop.permute.xlu2 %2277 }
 0x5a7   : > { %v2280_v15 = vunpack.i.h.bf16 %v2278_v56  ;;  %v2279_v9 = vunpack.i.l.bf16 %v2278_v56 }
 0x5a9   : > { %v1315_v34 = vsel %vm929_vm15, %v2279_v9, %v2280_v15  ;;  %v1316_v36 = vsel %vm929_vm15, %v2280_v15, %v1314_v53 }
 0x5ac   : > { %v1327_v60 = vpop.permute.xlu0 %1326 }
 0x5ae   : > { %v2283_v59 = vpop.permute.xlu2 %2282 }
 0x5af   : > { %v2285_v32 = vunpack.i.h.bf16 %v2283_v59  ;;  %v2284_v20 = vunpack.i.l.bf16 %v2283_v59 }
 0x5b1   : > { %v1279_v54 = vsel %vm887_vm12, %v2284_v20, %v2285_v32  ;;  %v1280_v56 = vsel %vm887_vm12, %v2285_v32, %v1278_v62  ;;  %v1218_v62 = vmul.f32 %v2640_v7, %v2827_v24  ;;  %v2900_v24 = vpop.f32.mrf.mxu3 }
 0x5b4   : > { %v1304_v63 = vpop.permute.xlu0 %1303 }
 0x5b6   : > { %v2293_v61 = vpop.permute.xlu2 %2292 }
 0x5b7   : > { %v2295_v2 = vunpack.i.h.bf16 %v2293_v61  ;;  %v2294_v3 = vunpack.i.l.bf16 %v2293_v61 }
 0x5b9   : > { %v1305_v25 = vsel %vm918_vm14, %v2294_v3, %v2295_v2  ;;  %v1306_v22 = vsel %vm918_vm14, %v2295_v2, %v1304_v63 }
 0x5ba   : > { %v1338_v21 = vpack.c.bf16 %v1315_v34, %v1305_v25  ;;  %v1339_v41 = vpack.c.bf16 %v1316_v36, %v1306_v22 }
 0x5be   : > { %v1291_v0 = vpop.permute.xlu2 %1290 }
 0x5c0   : > { %v2288_v1 = vpop.permute.xlu1 %2287 }
 0x5c1   : > { %v2290_v4 = vunpack.i.h.bf16 %v2288_v1  ;;  %v2289_v5 = vunpack.i.l.bf16 %v2288_v1  ;;  %v2298_v13 = vpop.permute.xlu0 %2297 }
 0x5c2   : > { %v2300_v26 = vunpack.i.h.bf16 %v2298_v13  ;;  %v2299_v27 = vunpack.i.l.bf16 %v2298_v13 }
 0x5c3   : > { %v1328_v14 = vsel %vm943_vm10, %v2289_v5, %v2290_v4  ;;  %v1329_v12 = vsel %vm943_vm10, %v2290_v4, %v1327_v60 }
 0x5c4   : > { %v1340_v16 = vpack.c.bf16 %v1328_v14, %v1328_v14  ;;  %v1341_v11 = vpack.c.bf16 %v1329_v12, %v1329_v12  ;;  %v1292_v45 = vsel %vm904_vm13, %v2299_v27, %v2300_v26  ;;  %v1293_v46 = vsel %vm904_vm13, %v2300_v26, %v1291_v0 }
 0x5c5   : > { %v1336_v58 = vpack.c.bf16 %v1292_v45, %v1279_v54  ;;  %v1337_v53 = vpack.c.bf16 %v1293_v46, %v1280_v56  ;;  %v1219_v12 = vmul.f32 %v2642_v10, %v2824_v19 }
 0x5c6   : > { %v1347_v29 = vsel %vm948_vm0, %v1340_v16, 0  ;;  %v1350_v30 = vsel %vm948_vm0, %v1341_v11, 0  ;;  %v2308_v37 = vpop.permute.xlu2 %2307  ;;  %v1205_v11 = vld [vmem:[%s3187_s8] sm:$0xf] }
 0x5c7   : > { %1355 = vmatpush.bf16.msra.mxu2 %v1347_v29  ;;  %1368 = vmatpush.bf16.msra.mxu3 %v1350_v30  ;;  %v2310_v47 = vunpack.i.h.bf16 %v2308_v37  ;;  %v2309_v49 = vunpack.i.l.bf16 %v2308_v37 }
 0x5c8   : > { %v2303_v33 = vpop.permute.xlu1 %2302 }
 0x5c9   : > { %v1255_v40 = vpop.permute.xlu0 %1254  ;;  %v2305_v43 = vunpack.i.h.bf16 %v2303_v33  ;;  %v2304_v44 = vunpack.i.l.bf16 %v2303_v33  ;;  %v1269_v61 = vsel %vm876_vm2, %v2309_v49, %v2310_v47  ;;  %v1378_v49 = vld [vmem:[%s3188_s9] sm:$0xff] }
 0x5cb   : > { %1356 = vmatpush.bf16.msra.mxu2 %v1338_v21  ;;  %1369 = vmatpush.bf16.msra.mxu3 %v1339_v41  ;;  %v1256_v59 = vsel %vm859_vm3, %v2304_v44, %v2305_v43  ;;  %v1257_v63 = vsel %vm859_vm3, %v2305_v43, %v1255_v40 }
 0x5cc   : > { %v1334_v2 = vpack.c.bf16 %v1269_v61, %v1256_v59  ;;  %v1379_v59 = vld [vmem:[%s3189_s10] sm:$0xff] }
 0x5ce   : > { %v1242_v13 = vpop.permute.xlu2 %1241 }
 0x5cf   : > { %1357 = vmatpush.bf16.msra.mxu2 %v1336_v58  ;;  %1370 = vmatpush.bf16.msra.mxu3 %v1337_v53 }
 0x5d0   : > { %v1268_v60 = vpop.permute.xlu1 %1267 }
 0x5d1   : > { %v1270_v0 = vsel %vm876_vm2, %v2310_v47, %v1268_v60  ;;  %v2313_v1 = vpop.permute.xlu0 %2312 }
 0x5d2   : > { %v1335_v3 = vpack.c.bf16 %v1270_v0, %v1257_v63  ;;  %v2315_v4 = vunpack.i.h.bf16 %v2313_v1  ;;  %v2314_v5 = vunpack.i.l.bf16 %v2313_v1 }
 0x5d3   : > { %1358 = vmatpush.bf16.msra.mxu2 %v1334_v2 }
 0x5d4   : > { %1371 = vmatpush.bf16.msra.mxu3 %v1335_v3  ;;  %v1243_v14 = vsel %vm3215_vm1, %v2314_v5, %v2315_v4  ;;  %v1244_v15 = vsel %vm3215_vm1, %v2315_v4, %v1242_v13 }
 0x5d5   : > { %v1332_v9 = vpack.c.bf16 %v1243_v14, %v1218_v62  ;;  %v1333_v16 = vpack.c.bf16 %v1244_v15, %v1219_v12 }
 0x5d7   : > { %1359 = vmatpush.bf16.msra.mxu2 %v1332_v9 }
 0x5d8   : > { %1372 = vmatpush.bf16.msra.mxu3 %v1333_v16 }
 0x5da   : > { %2170 = vmatmul.msk.bf16.vlgmr.msra.gmra.mxu2 %vm3214_vm9, %v1205_v11 }
 0x5db   : > { %2171 = vmatmul.msk.bf16.vlgmr.msra.gmra.mxu3 %vm3214_vm9, %v1205_v11 }
 0x65d   : > { %v1361_v25 = vpop.f32.mrf.mxu2 }
 0x65e   : > { %v1374_v22 = vpop.f32.mrf.mxu3  ;;  %v1384_v19 = vmul.f32 %v1361_v25, %v1361_v25 }
 0x65f   : > { %v1380_v26 = vadd.f32 %v1374_v22, %v1361_v25  ;;  %v1385_v27 = vmul.f32 %v1374_v22, %v1374_v22 }
 0x661   : > { %1381 = vadd.xlane.f32.xlu1 %v1380_v26  ;;  %v1386_v29 = vadd.f32 %v1385_v27, %v1384_v19 }
 0x663   : > { %1387 = vadd.xlane.f32.xlu0 %v1386_v29 }
 0x665   : > { %v1363_v30 = vpop.f32.mrf.mxu2 }
 0x666   : > { %v1376_v32 = vpop.f32.mrf.mxu3 }
 0x6d4   : > { %v1382_v20 = vpop.xlane.xlu1 %1381 }
 0x6d5   : > { %v1383_v33 = vmul.f32 0.00390625, %v1382_v20 }
 0x6d6   : > { %v1388_v34 = vpop.xlane.xlu0 %1387 }
 0x6d7   : > { %v1390_v36 = vmul.f32 %v1383_v33, %v1383_v33  ;;  %v1389_v37 = vmul.f32 0.00390625, %v1388_v34 }
 0x6d9   : > { %v1391_v40 = vsub.f32 %v1389_v37, %v1390_v36 }
 0x6db   : > { %v1392_v21 = vmax.f32 %v1391_v40, 0.0 }
 0x6dd   : > { %v1393_v41 = vadd.f32 1e-05, %v1392_v21 }
 0x6df   : > { %2449 = vrsqrt.f32 %v1393_v41  ;;  %vm1400_vm5 = vweird.f32 %v1393_v41 }
 0x6e5   : > { %v2450_v43 = vpop.eup %2449 }
 0x6e6   : > { %v1395_v44 = vmul.f32 %v2450_v43, %v1393_v41  ;;  %vm1401_vm11 = vweird.f32 %v2450_v43 }
 0x6e7   : > { %vm1402_vm6 = vmor %vm1400_vm5, %vm1401_vm11 }
 0x6e8   : > { %v1396_v45 = vmul.f32 %v2450_v43, %v1395_v44 }
 0x6ea   : > { %v1397_v46 = vmul.f32 0.5, %v1396_v45 }
 0x6ec   : > { %v1398_v47 = vsub.f32 1.5, %v1397_v46 }
 0x6ee   : > { %v1399_v54 = vmul.f32 %v2450_v43, %v1398_v47 }
 0x6f0   : > { %v1403_v56 = vsel %vm1402_vm6, %v2450_v43, %v1399_v54 }
 0x6f1   : > { %v1404_v58 = vmul.f32 %v1403_v56, %v1378_v49 }
 0x6f3   : > { %1409 = vperm.xlu2 %2275, %v1404_v58   ;;  %v1405_v53 = vmul.f32 %v1404_v58, %v1383_v33 }
 0x6f5   : > { %v1406_v60 = vsub.f32 %v1379_v59, %v1405_v53 }
 0x6fb   : > { %1416 = vperm.xlu2 %2275, %v1406_v60  }
 0x74d   : > { %v1410_v61 = vpop.permute.xlu2 %1409 }
 0x74e   : > { %v1412_v63 = vmul.f32 %v1410_v61, %v1361_v25  ;;  %v1413_v2 = vmul.f32 %v1410_v61, %v1374_v22 }
 0x755   : > { %v1417_v0 = vpop.permute.xlu2 %1416 }
 0x756   : > { %v1419_v1 = vadd.f32 %v1417_v0, %v1412_v63  ;;  %v1420_v3 = vadd.f32 %v1417_v0, %v1413_v2 }
 0x758   : > { %2451 = vtanh.f32 %v1419_v1 }
 0x759   : > { %2453 = vtanh.f32 %v1420_v3 }
 0x75e   : > { %v2452_v4 = vpop.eup %2451 }
 0x75f   : > { %1426 = vrot.lane.b32.xlu2 %v2452_v4, %s2490_s27  ;;  %v2454_v5 = vpop.eup %2453 }
 0x767   : > { %1428 = vrot.lane.b32.xlu2 %v2454_v5, %s2490_s27 }
 0x7b9   : > { %v1427_v13 = vpop.permute.xlu2 %1426 }
 0x7ba   : > { %v2911_v14 = vsel %vm761_vm4, 0.0, %v1427_v13 }
 0x7bb   : > { %v1447_v25 = vmul.f32 %v2680_v31, %v2911_v14  ;;  %v1438_v26 = vmul.f32 %v2718_v52, %v2911_v14  ;;  %v1450_v30 = vmul.f32 %v2650_v18, %v2911_v14  ;;  %v1441_v36 = vmul.f32 %v2714_v50, %v2911_v14 }
 0x7bc   : > { %v1444_v41 = vmul.f32 %v2692_v39, %v2911_v14 }
 0x7c1   : > { %v1429_v62 = vpop.permute.xlu2 %1428 }
 0x7c2   : > { %v2914_v12 = vsel %vm761_vm4, %v1427_v13, %v1429_v62  ;;  %v1435_v15 = vsel %vm761_vm4, %v1429_v62, 0.0 }
 0x7c3   : > { %1495 = vrot.lane.b32.xlu1 %v1435_v15, %s2494_s3  ;;  %v2321_v9 = vpack.i.bf16 %v2914_v12, %v2911_v14  ;;  %v1448_v16 = vmul.f32 %v2914_v12, %v2685_v35  ;;  %v1452_v11 = vmul.f32 %v2648_v17, %v1435_v15  ;;  %v1439_v19 = vmul.f32 %v2914_v12, %v2728_v57 }
 0x7c4   : > { %v1451_v27 = vmul.f32 %v2914_v12, %v2663_v23  ;;  %v1446_v20 = vmul.f32 %v2690_v38, %v1435_v15  ;;  %v1442_v33 = vmul.f32 %v2914_v12, %v2724_v55  ;;  %v1443_v34 = vmul.f32 %v2708_v48, %v1435_v15 }
 0x7c5   : > { %2322 = vrot.lane.b32.xlu0 %v2321_v9, %s2494_s3  ;;  %2317 = vrot.lane.b32.xlu2 %v2321_v9, %s2497_s5  ;;  %v2331_v22 = vpack.i.bf16 %v1448_v16, %v1447_v25  ;;  %v2341_v29 = vpack.i.bf16 %v1439_v19, %v1438_v26  ;;  %v1449_v37 = vmul.f32 %v2675_v28, %v1435_v15 }
 0x7c6   : > { %v2326_v32 = vpack.i.bf16 %v1451_v27, %v1450_v30  ;;  %v2346_v40 = vpack.i.bf16 %v1442_v33, %v1441_v36  ;;  %v1445_v21 = vmul.f32 %v2914_v12, %v2702_v42  ;;  %v1440_v44 = vmul.f32 %v2716_v51, %v1435_v15 }
 0x7c8   : > { %v2336_v43 = vpack.i.bf16 %v1445_v21, %v1444_v41 }
 0x7cb   : > { %1544 = vrot.lane.b32.xlu1 %v1452_v11, %s2495_s0 }
 0x7cd   : > { %1531 = vrot.lane.b32.xlu2 %v1435_v15, %s2497_s5  ;;  %2332 = vrot.lane.b32.xlu0 %v2331_v22, %s3232_s2 }
 0x7d3   : > { %2342 = vrot.lane.b32.xlu1 %v2341_v29, %s3234_s28 }
 0x7d5   : > { %2327 = vrot.lane.b32.xlu2 %v2326_v32, %s2495_s0  ;;  %1508 = vrot.lane.b32.xlu0 %v1446_v20, %s3233_s7 }
 0x7db   : > { %1485 = vrot.lane.b32.xlu1 %v1443_v34, %s3235_s29 }
 0x7dd   : > { %1521 = vrot.lane.b32.xlu2 %v1449_v37, %s3232_s2  ;;  %2347 = vrot.lane.b32.xlu0 %v2346_v40, %s3235_s29 }
 0x7e5   : > { %2337 = vrot.lane.b32.xlu2 %v2336_v43, %s3233_s7  ;;  %1459 = vrot.lane.b32.xlu0 %v1435_v15, %s3236_s24 }
 0x7ed   : > { %1472 = vrot.lane.b32.xlu2 %v1440_v44, %s3234_s28 }
 0x7f5   : > { %2352 = vrot.lane.b32.xlu2 %v2321_v9, %s3236_s24 }
 0x81f   : > { %v2318_v45 = vpop.permute.xlu2 %2317 }
 0x820   : > { %v2320_v63 = vunpack.i.h.bf16 %v2318_v45  ;;  %v2319_v0 = vunpack.i.l.bf16 %v2318_v45 }
 0x822   : > { %v1533_v25 = vsel %vm929_vm15, %v2319_v0, %v2320_v63 }
 0x827   : > { %v1532_v46 = vpop.permute.xlu2 %1531 }
 0x828   : > { %v1534_v16 = vsel %vm929_vm15, %v2320_v63, %v1532_v46 }
 0x82f   : > { %v2328_v47 = vpop.permute.xlu2 %2327 }
 0x830   : > { %v2330_v49 = vunpack.i.h.bf16 %v2328_v47  ;;  %v2329_v54 = vunpack.i.l.bf16 %v2328_v47 }
 0x832   : > { %v1546_v56 = vsel %vm943_vm10, %v2329_v54, %v2330_v49 }
 0x833   : > { %v1558_v58 = vpack.c.bf16 %v1546_v56, %v1546_v56 }
 0x835   : > { %v1496_v53 = vpop.permute.xlu1 %1495  ;;  %v1564_v59 = vsel %vm948_vm0, %v1558_v58, 0 }
 0x836   : > { %1572 = vmatpush.bf16.msrb.mxu0 %v1564_v59 }
 0x837   : > { %v2323_v60 = vpop.permute.xlu0 %2322  ;;  %v1522_v61 = vpop.permute.xlu2 %1521 }
 0x838   : > { %v2325_v22 = vunpack.i.h.bf16 %v2323_v60  ;;  %v2324_v19 = vunpack.i.l.bf16 %v2323_v60 }
 0x83a   : > { %v1497_v33 = vsel %vm887_vm12, %v2324_v19, %v2325_v22  ;;  %v1498_v21 = vsel %vm887_vm12, %v2325_v22, %v1496_v53 }
 0x83d   : > { %v1545_v1 = vpop.permute.xlu1 %1544 }
 0x83e   : > { %v1547_v2 = vsel %vm943_vm10, %v2330_v49, %v1545_v1 }
 0x83f   : > { %v1559_v3 = vpack.c.bf16 %v1547_v2, %v1547_v2  ;;  %v2333_v4 = vpop.permute.xlu0 %2332  ;;  %v2338_v5 = vpop.permute.xlu2 %2337  ;;  %v1436_v2 = vmul.f32 %v2640_v7, %v2911_v14 }
 0x840   : > { %v2335_v13 = vunpack.i.h.bf16 %v2333_v4  ;;  %v2334_v62 = vunpack.i.l.bf16 %v2333_v4  ;;  %v2340_v15 = vunpack.i.h.bf16 %v2338_v5  ;;  %v2339_v9 = vunpack.i.l.bf16 %v2338_v5 }
 0x841   : > { %v1567_v11 = vsel %vm948_vm0, %v1559_v3, 0  ;;  %v1437_v5 = vmul.f32 %v2642_v10, %v2914_v12 }
 0x842   : > { %1585 = vmatpush.bf16.msrb.mxu1 %v1567_v11  ;;  %v1523_v26 = vsel %vm918_vm14, %v2334_v62, %v2335_v13  ;;  %v1524_v27 = vsel %vm918_vm14, %v2335_v13, %v1522_v61  ;;  %v1510_v32 = vsel %vm904_vm13, %v2339_v9, %v2340_v15 }
 0x843   : > { %v1556_v29 = vpack.c.bf16 %v1533_v25, %v1523_v26  ;;  %v1557_v30 = vpack.c.bf16 %v1534_v16, %v1524_v27  ;;  %v1554_v37 = vpack.c.bf16 %v1510_v32, %v1497_v33 }
 0x845   : > { %1573 = vmatpush.bf16.msrb.mxu0 %v1556_v29  ;;  %v2343_v20 = vpop.permute.xlu1 %2342 }
 0x846   : > { %1586 = vmatpush.bf16.msrb.mxu1 %v1557_v30  ;;  %v2345_v43 = vunpack.i.h.bf16 %v2343_v20  ;;  %v2344_v44 = vunpack.i.l.bf16 %v2343_v20 }
 0x847   : > { %v1509_v34 = vpop.permute.xlu0 %1508  ;;  %v1473_v36 = vpop.permute.xlu2 %1472 }
 0x848   : > { %v1511_v40 = vsel %vm904_vm13, %v2340_v15, %v1509_v34  ;;  %v1475_v59 = vsel %vm859_vm3, %v2345_v43, %v1473_v36  ;;  %v1474_v60 = vsel %vm859_vm3, %v2344_v44, %v2345_v43  ;;  %v1423_v15 = vld [vmem:[%s3190_s11] sm:$0xf] }
 0x849   : > { %1574 = vmatpush.bf16.msrb.mxu0 %v1554_v37  ;;  %v1555_v41 = vpack.c.bf16 %v1511_v40, %v1498_v21  ;;  %v1595_v43 = vld [vmem:[%s3191_s12] sm:$0xff] }
 0x84b   : > { %1587 = vmatpush.bf16.msrb.mxu1 %v1555_v41 }
 0x84d   : > { %v1486_v58 = vpop.permute.xlu1 %1485 }
 0x84f   : > { %v2353_v45 = vpop.permute.xlu2 %2352  ;;  %v2348_v46 = vpop.permute.xlu0 %2347 }
 0x850   : > { %v2355_v47 = vunpack.i.h.bf16 %v2353_v45  ;;  %v2354_v49 = vunpack.i.l.bf16 %v2353_v45  ;;  %v2350_v54 = vunpack.i.h.bf16 %v2348_v46  ;;  %v2349_v56 = vunpack.i.l.bf16 %v2348_v46 }
 0x852   : > { %v1487_v61 = vsel %vm876_vm2, %v2349_v56, %v2350_v54  ;;  %v1488_v53 = vsel %vm876_vm2, %v2350_v54, %v1486_v58  ;;  %v1461_v1 = vsel %vm3215_vm1, %v2354_v49, %v2355_v47  ;;  %v1596_v49 = vld [vmem:[%s3192_s13] sm:$0xff] }
 0x853   : > { %v1552_v63 = vpack.c.bf16 %v1487_v61, %v1474_v60  ;;  %v1553_v0 = vpack.c.bf16 %v1488_v53, %v1475_v59  ;;  %v1550_v4 = vpack.c.bf16 %v1461_v1, %v1436_v2  ;;  %v1138_v1 = vld [vmem:[%s3198_s19] sm:$0xff] }
 0x854   : > { %v1184_v2 = vadd.f32 %v2900_v24, %v1138_v1 }
 0x855   : > { %1575 = vmatpush.bf16.msrb.mxu0 %v1552_v63  ;;  %1588 = vmatpush.bf16.msrb.mxu1 %v1553_v0 }
 0x857   : > { %v1460_v3 = vpop.permute.xlu0 %1459 }
 0x858   : > { %v1462_v13 = vsel %vm3215_vm1, %v2355_v47, %v1460_v3 }
 0x859   : > { %1576 = vmatpush.bf16.msrb.mxu0 %v1550_v4  ;;  %v1551_v62 = vpack.c.bf16 %v1462_v13, %v1437_v5  ;;  %v2169_v4 = vmul.f32 -1.442695, %v1184_v2 }
 0x85b   : > { %1589 = vmatpush.bf16.msrb.mxu1 %v1551_v62 }
 0x85c   : > { %2172 = vmatmul.msk.bf16.vlgmr.msrb.gmra.mxu0 %vm3214_vm9, %v1423_v15 }
 0x85e   : > { %2173 = vmatmul.msk.bf16.vlgmr.msrb.gmra.mxu1 %vm3214_vm9, %v1423_v15 }
 0x8d9   : > { %v1578_v9 = vpop.f32.mrf.mxu0 }
 0x8da   : > { %v1601_v14 = vmul.f32 %v1578_v9, %v1578_v9 }
 0x8db   : > { %v1591_v16 = vpop.f32.mrf.mxu1 }
 0x8dc   : > { %v1597_v11 = vadd.f32 %v1591_v16, %v1578_v9  ;;  %v1602_v25 = vmul.f32 %v1591_v16, %v1591_v16 }
 0x8de   : > { %1598 = vadd.xlane.f32.xlu1 %v1597_v11  ;;  %v1603_v12 = vadd.f32 %v1602_v25, %v1601_v14 }
 0x8e0   : > { %1604 = vadd.xlane.f32.xlu2 %v1603_v12 }
 0x8e1   : > { %v1580_v22 = vpop.f32.mrf.mxu0 }
 0x8e3   : > { %v1593_v19 = vpop.f32.mrf.mxu1 }
 0x951   : > { %v1599_v26 = vpop.xlane.xlu1 %1598 }
 0x952   : > { %v1600_v27 = vmul.f32 0.00390625, %v1599_v26 }
 0x953   : > { %v1605_v29 = vpop.xlane.xlu2 %1604 }
 0x954   : > { %v1607_v30 = vmul.f32 %v1600_v27, %v1600_v27  ;;  %v1606_v32 = vmul.f32 0.00390625, %v1605_v29 }
 0x956   : > { %v1608_v20 = vsub.f32 %v1606_v32, %v1607_v30 }
 0x958   : > { %v1609_v33 = vmax.f32 %v1608_v20, 0.0 }
 0x95a   : > { %v1610_v34 = vadd.f32 1e-05, %v1609_v33 }
 0x95c   : > { %2455 = vrsqrt.f32 %v1610_v34  ;;  %vm1617_vm8 = vweird.f32 %v1610_v34 }
 0x962   : > { %v2456_v36 = vpop.eup %2455 }
 0x963   : > { %v1612_v37 = vmul.f32 %v2456_v36, %v1610_v34  ;;  %vm1618_vm7 = vweird.f32 %v2456_v36 }
 0x964   : > { %vm1619_vm11 = vmor %vm1617_vm8, %vm1618_vm7 }
 0x965   : > { %v1613_v40 = vmul.f32 %v2456_v36, %v1612_v37 }
 0x967   : > { %v1614_v21 = vmul.f32 0.5, %v1613_v40 }
 0x969   : > { %v1615_v41 = vsub.f32 1.5, %v1614_v21 }
 0x96b   : > { %v1616_v44 = vmul.f32 %v2456_v36, %v1615_v41 }
 0x96d   : > { %v1620_v45 = vsel %vm1619_vm11, %v2456_v36, %v1616_v44 }
 0x96e   : > { %v1621_v46 = vmul.f32 %v1620_v45, %v1595_v43 }
 0x970   : > { %1626 = vperm.xlu0 %2356, %v1621_v46   ;;  %v1622_v47 = vmul.f32 %v1621_v46, %v1600_v27 }
 0x972   : > { %v1623_v54 = vsub.f32 %v1596_v49, %v1622_v47 }
 0x978   : > { %1633 = vperm.xlu0 %2356, %v1623_v54  }
 0x9e2   : > { %v1627_v56 = vpop.permute.xlu0 %1626 }
 0x9e3   : > { %v1629_v58 = vmul.f32 %v1627_v56, %v1578_v9  ;;  %v1630_v61 = vmul.f32 %v1627_v56, %v1591_v16 }
 0x9ea   : > { %v1634_v59 = vpop.permute.xlu0 %1633 }
 0x9eb   : > { %v1636_v60 = vadd.f32 %v1634_v59, %v1629_v58  ;;  %v1637_v53 = vadd.f32 %v1634_v59, %v1630_v61  ;;  %v1777_v61 = vld [vmem:[%s3194_s15] sm:$0xff] }
 0x9ed   : > { %2457 = vtanh.f32 %v1636_v60 }
 0x9ee   : > { %2459 = vtanh.f32 %v1637_v53 }
 0x9ef   : > { %2461 = vpow2.f32 %v2169_v4 }
 0x9f3   : > { %v2458_v63 = vpop.eup %2457 }
 0x9f4   : > { %1643 = vrot.lane.b32.xlu0 %v2458_v63, %s2490_s27  ;;  %v2460_v0 = vpop.eup %2459 }
 0x9f5   : > { %v2462_v14 = vpop.eup %2461 }
 0x9f6   : > { %v1189_v25 = vadd.f32 1.0, %v2462_v14 }
 0x9f8   : > { %2463 = vrcp.f32 %v1189_v25  ;;  %vm1195_vm5 = vweird.f32 %v1189_v25  ;;  %v1201_v46 = vand.u32 2147483648, %v1189_v25  ;;  %v1199_v54 = vand.u32 2147483647, %v1189_v25 }
 0x9fa   : > { %v1202_v56 = vor.u32 1.1754944e-38, %v1201_v46  ;;  %vm1200_vm8 = vcmp.eq.f32.partialorder %v1199_v54, 8.507059e+37 }
 0x9fc   : > { %1645 = vrot.lane.b32.xlu0 %v2460_v0, %s2490_s27 }
 0x9fe   : > { %v2464_v20 = vpop.eup %2463 }
 0x9ff   : > { %v1191_v34 = vmul.f32 %v2464_v20, %v1189_v25  ;;  %vm1196_vm6 = vweird.f32 %v2464_v20 }
 0xa00   : > { %vm1197_vm7 = vmor %vm1195_vm5, %vm1196_vm6 }
 0xa01   : > { %v1192_v41 = vsub.f32 1.0, %v1191_v34 }
 0xa03   : > { %v1193_v44 = vmul.f32 %v2464_v20, %v1192_v41 }
 0xa05   : > { %v1194_v49 = vadd.f32 %v2464_v20, %v1193_v44 }
 0xa07   : > { %v1198_v58 = vsel %vm1197_vm7, %v2464_v20, %v1194_v49 }
 0xa08   : > { %v1203_v59 = vsel %vm1200_vm8, %v1202_v56, %v1198_v58 }
 0xa66   : > { %v1644_v3 = vpop.permute.xlu0 %1643 }
 0xa67   : > { %v3000_v13 = vsel %vm761_vm4, 0.0, %v1644_v3 }
 0xa68   : > { %v1667_v16 = vmul.f32 %v2650_v18, %v3000_v13  ;;  %v1661_v19 = vmul.f32 %v2692_v39, %v3000_v13  ;;  %v1664_v29 = vmul.f32 %v2680_v31, %v3000_v13  ;;  %v1658_v37 = vmul.f32 %v2714_v50, %v3000_v13 }
 0xa69   : > { %v1655_v45 = vmul.f32 %v2718_v52, %v3000_v13 }
 0xa6e   : > { %v1646_v5 = vpop.permute.xlu0 %1645 }
 0xa6f   : > { %v3003_v62 = vsel %vm761_vm4, %v1644_v3, %v1646_v5  ;;  %v1652_v15 = vsel %vm761_vm4, %v1646_v5, 0.0 }
 0xa70   : > { %1748 = vrot.lane.b32.xlu1 %v1652_v15, %s2497_s5  ;;  %v2362_v9 = vpack.i.bf16 %v3003_v62, %v3000_v13  ;;  %v1668_v24 = vmul.f32 %v3003_v62, %v2663_v23  ;;  %v1669_v12 = vmul.f32 %v2648_v17, %v1652_v15  ;;  %v1662_v22 = vmul.f32 %v3003_v62, %v2702_v42 }
 0xa71   : > { %v1665_v26 = vmul.f32 %v3003_v62, %v2685_v35  ;;  %v1663_v30 = vmul.f32 %v2690_v38, %v1652_v15  ;;  %v1659_v33 = vmul.f32 %v3003_v62, %v2724_v55  ;;  %v1657_v36 = vmul.f32 %v2716_v51, %v1652_v15 }
 0xa72   : > { %2363 = vrot.lane.b32.xlu2 %v2362_v9, %s2494_s3  ;;  %2358 = vrot.lane.b32.xlu0 %v2362_v9, %s2497_s5  ;;  %v2367_v11 = vpack.i.bf16 %v1668_v24, %v1667_v16  ;;  %v2377_v27 = vpack.i.bf16 %v1662_v22, %v1661_v19  ;;  %v1666_v40 = vmul.f32 %v2675_v28, %v1652_v15 }
 0xa73   : > { %v2372_v32 = vpack.i.bf16 %v1665_v26, %v1664_v29  ;;  %v2387_v21 = vpack.i.bf16 %v1659_v33, %v1658_v37  ;;  %v1656_v43 = vmul.f32 %v3003_v62, %v2728_v57  ;;  %v1660_v60 = vmul.f32 %v2708_v48, %v1652_v15 }
 0xa75   : > { %v2382_v47 = vpack.i.bf16 %v1656_v43, %v1655_v45 }
 0xa78   : > { %2368 = vrot.lane.b32.xlu1 %v2367_v11, %s2495_s0 }
 0xa7a   : > { %1761 = vrot.lane.b32.xlu2 %v1669_v12, %s2495_s0  ;;  %1712 = vrot.lane.b32.xlu0 %v1652_v15, %s2494_s3 }
 0xa80   : > { %2378 = vrot.lane.b32.xlu1 %v2377_v27, %s3233_s7 }
 0xa82   : > { %1725 = vrot.lane.b32.xlu2 %v1663_v30, %s3233_s7  ;;  %2373 = vrot.lane.b32.xlu0 %v2372_v32, %s3232_s2 }
 0xa88   : > { %1689 = vrot.lane.b32.xlu1 %v1657_v36, %s3234_s28 }
 0xa8a   : > { %1738 = vrot.lane.b32.xlu0 %v1666_v40, %s3232_s2  ;;  %2388 = vrot.lane.b32.xlu2 %v2387_v21, %s3235_s29 }
 0xa90   : > { %2393 = vrot.lane.b32.xlu1 %v2362_v9, %s3236_s24 }
 0xa92   : > { %1676 = vrot.lane.b32.xlu2 %v1652_v15, %s3236_s24  ;;  %2383 = vrot.lane.b32.xlu0 %v2382_v47, %s3234_s28 }
 0xa98   : > { %1858 = vperm.xlu1 %2274, %v1203_v59  }
 0xa9a   : > { %1702 = vrot.lane.b32.xlu0 %v1660_v60, %s3235_s29 }
 0xaa2   : > { %1780 = vperm.xlu0 %2356, %v1777_v61  }
 0xacc   : > { %v2364_v53 = vpop.permute.xlu2 %2363 }
 0xacd   : > { %v2366_v20 = vunpack.i.h.bf16 %v2364_v53  ;;  %v2365_v33 = vunpack.i.l.bf16 %v2364_v53 }
 0xacf   : > { %v1714_v41 = vsel %vm887_vm12, %v2365_v33, %v2366_v20 }
 0xad4   : > { %v1762_v4 = vpop.permute.xlu2 %1761 }
 0xadc   : > { %v1726_v32 = vpop.permute.xlu2 %1725 }
 0xae2   : > { %v1749_v63 = vpop.permute.xlu1 %1748 }
 0xae4   : > { %v2359_v0 = vpop.permute.xlu0 %2358  ;;  %v2389_v54 = vpop.permute.xlu2 %2388 }
 0xae5   : > { %v2361_v12 = vunpack.i.h.bf16 %v2359_v0  ;;  %v2360_v22 = vunpack.i.l.bf16 %v2359_v0  ;;  %v2391_v60 = vunpack.i.h.bf16 %v2389_v54  ;;  %v2390_v61 = vunpack.i.l.bf16 %v2389_v54 }
 0xae7   : > { %v1750_v36 = vsel %vm929_vm15, %v2360_v22, %v2361_v12  ;;  %v1751_v45 = vsel %vm929_vm15, %v2361_v12, %v1749_v63  ;;  %v1640_v22 = vld [vmem:[%s3193_s14] sm:$0xf] }
 0xaea   : > { %v2369_v1 = vpop.permute.xlu1 %2368 }
 0xaeb   : > { %v2371_v2 = vunpack.i.h.bf16 %v2369_v1  ;;  %v2370_v3 = vunpack.i.l.bf16 %v2369_v1 }
 0xaec   : > { %v1713_v5 = vpop.permute.xlu0 %1712 }
 0xaed   : > { %v1763_v9 = vsel %vm943_vm10, %v2370_v3, %v2371_v2  ;;  %v1764_v24 = vsel %vm943_vm10, %v2371_v2, %v1762_v4  ;;  %v1715_v56 = vsel %vm887_vm12, %v2366_v20, %v1713_v5  ;;  %v1704_v4 = vsel %vm876_vm2, %v2390_v61, %v2391_v60 }
 0xaee   : > { %v1775_v15 = vpack.c.bf16 %v1763_v9, %v1763_v9  ;;  %v1776_v14 = vpack.c.bf16 %v1764_v24, %v1764_v24  ;;  %v1653_v5 = vmul.f32 %v2640_v7, %v3000_v13 }
 0xaf0   : > { %v1787_v16 = vsel %vm948_vm0, %v1775_v15, 0  ;;  %v1790_v11 = vsel %vm948_vm0, %v1776_v14, 0 }
 0xaf1   : > { %1795 = vmatpush.bf16.msrb.mxu2 %v1787_v16  ;;  %1808 = vmatpush.bf16.msrb.mxu3 %v1790_v11 }
 0xaf2   : > { %v2379_v25 = vpop.permute.xlu1 %2378 }
 0xaf3   : > { %v2381_v26 = vunpack.i.h.bf16 %v2379_v25  ;;  %v2380_v27 = vunpack.i.l.bf16 %v2379_v25  ;;  %v1677_v25 = vpop.permute.xlu2 %1676 }
 0xaf4   : > { %v2374_v19 = vpop.permute.xlu0 %2373 }
 0xaf5   : > { %v2376_v29 = vunpack.i.h.bf16 %v2374_v19  ;;  %v2375_v30 = vunpack.i.l.bf16 %v2374_v19  ;;  %v1727_v40 = vsel %vm904_vm13, %v2380_v27, %v2381_v26  ;;  %v1728_v49 = vsel %vm904_vm13, %v2381_v26, %v1726_v32 }
 0xaf6   : > { %v1771_v44 = vpack.c.bf16 %v1727_v40, %v1714_v41  ;;  %v1772_v59 = vpack.c.bf16 %v1728_v49, %v1715_v56  ;;  %v1654_v26 = vmul.f32 %v2642_v10, %v3003_v62 }
 0xaf7   : > { %v1740_v34 = vsel %vm918_vm14, %v2375_v30, %v2376_v29 }
 0xaf8   : > { %v1773_v37 = vpack.c.bf16 %v1750_v36, %v1740_v34 }
 0xafa   : > { %1796 = vmatpush.bf16.msrb.mxu2 %v1773_v37  ;;  %v1690_v21 = vpop.permute.xlu1 %1689 }
 0xafc   : > { %v1739_v43 = vpop.permute.xlu0 %1738 }
 0xafd   : > { %v1741_v46 = vsel %vm918_vm14, %v2376_v29, %v1739_v43 }
 0xafe   : > { %v1774_v47 = vpack.c.bf16 %v1751_v45, %v1741_v46  ;;  %1797 = vmatpush.bf16.msrb.mxu2 %v1771_v44 }
 0xb00   : > { %1809 = vmatpush.bf16.msrb.mxu3 %v1774_v47 }
 0xb02   : > { %v2394_v58 = vpop.permute.xlu1 %2393 }
 0xb03   : > { %v2396_v0 = vunpack.i.h.bf16 %v2394_v58  ;;  %v2395_v1 = vunpack.i.l.bf16 %v2394_v58 }
 0xb04   : > { %1810 = vmatpush.bf16.msrb.mxu3 %v1772_v59  ;;  %v2384_v53 = vpop.permute.xlu0 %2383 }
 0xb05   : > { %v2386_v2 = vunpack.i.h.bf16 %v2384_v53  ;;  %v2385_v63 = vunpack.i.l.bf16 %v2384_v53  ;;  %v1678_v24 = vsel %vm3215_vm1, %v2395_v1, %v2396_v0  ;;  %v1679_v19 = vsel %vm3215_vm1, %v2396_v0, %v1677_v25 }
 0xb06   : > { %v1767_v14 = vpack.c.bf16 %v1678_v24, %v1653_v5  ;;  %v1768_v13 = vpack.c.bf16 %v1679_v19, %v1654_v26 }
 0xb07   : > { %v1691_v3 = vsel %vm859_vm3, %v2385_v63, %v2386_v2  ;;  %v1692_v16 = vsel %vm859_vm3, %v2386_v2, %v1690_v21 }
 0xb08   : > { %v1769_v9 = vpack.c.bf16 %v1704_v4, %v1691_v3 }
 0xb0a   : > { %1798 = vmatpush.bf16.msrb.mxu2 %v1769_v9  ;;  %v1859_v56 = vpop.permute.xlu1 %1858 }
 0xb0b   : > { %v1861_v61 = vsub.f32 %v2804_v6, %v1859_v56 }
 0xb0c   : > { %v1703_v15 = vpop.permute.xlu0 %1702 }
 0xb0d   : > { %v1705_v11 = vsel %vm876_vm2, %v2391_v60, %v1703_v15  ;;  %v1862_v15 = vsub.f32 %v2806_v8, %v1859_v56 }
 0xb0e   : > { %v1770_v12 = vpack.c.bf16 %v1705_v11, %v1692_v16  ;;  %1799 = vmatpush.bf16.msrb.mxu2 %v1767_v14 }
 0xb10   : > { %1811 = vmatpush.bf16.msrb.mxu3 %v1770_v12 }
 0xb11   : > { %2174 = vmatmul.msk.bf16.vlgmr.msrb.gmra.mxu2 %vm3214_vm9, %v1640_v22 }
 0xb14   : > { %1812 = vmatpush.bf16.msrb.mxu3 %v1768_v13  ;;  %v1781_v27 = vpop.permute.xlu0 %1780 }
 0xb17   : > { %2175 = vmatmul.msk.bf16.vlgmr.msrb.gmra.mxu3 %vm3214_vm9, %v1640_v22 }
 0xb94   : > { %v1801_v29 = vpop.f32.mrf.mxu2 }
 0xb95   : > { %v1802_v30 = vadd.f32 %v1801_v29, %v1781_v27 }
 0xb97   : > { %v2176_v32 = vmul.f32 -1.442695, %v1802_v30 }
 0xb99   : > { %2465 = vpow2.f32 %v2176_v32 }
 0xb9a   : > { %v1814_v20 = vpop.f32.mrf.mxu3 }
 0xb9b   : > { %v1815_v33 = vadd.f32 %v1814_v20, %v1781_v27 }
 0xb9c   : > { %v1803_v34 = vpop.f32.mrf.mxu2 }
 0xb9d   : > { %v2177_v36 = vmul.f32 -1.442695, %v1815_v33 }
 0xb9f   : > { %v2466_v37 = vpop.eup %2465  ;;  %2467 = vpow2.f32 %v2177_v36 }
 0xba0   : > { %v1824_v40 = vadd.f32 1.0, %v2466_v37 }
 0xba2   : > { %2469 = vrcp.f32 %v1824_v40  ;;  %v1816_v62 = vpop.f32.mrf.mxu3  ;;  %v1837_v46 = vand.u32 2147483648, %v1824_v40  ;;  %v1835_v49 = vand.u32 2147483647, %v1824_v40  ;;  %vm1831_vm5 = vweird.f32 %v1824_v40 }
 0xba4   : > { %v1838_v60 = vor.u32 1.1754944e-38, %v1837_v46  ;;  %vm1836_vm7 = vcmp.eq.f32.partialorder %v1835_v49, 8.507059e+37 }
 0xba5   : > { %v2468_v21 = vpop.eup %2467 }
 0xba6   : > { %v1825_v41 = vadd.f32 1.0, %v2468_v21 }
 0xba8   : > { %v2470_v43 = vpop.eup %2469  ;;  %2471 = vrcp.f32 %v1825_v41  ;;  %v1852_v2 = vand.u32 2147483648, %v1825_v41  ;;  %v1850_v4 = vand.u32 2147483647, %v1825_v41  ;;  %vm1846_vm9 = vweird.f32 %v1825_v41 }
 0xba9   : > { %v1827_v44 = vmul.f32 %v2470_v43, %v1824_v40  ;;  %vm1832_vm11 = vweird.f32 %v2470_v43 }
 0xbaa   : > { %vm1833_vm6 = vmor %vm1831_vm5, %vm1832_vm11  ;;  %v1853_v5 = vor.u32 1.1754944e-38, %v1852_v2  ;;  %vm1851_vm11 = vcmp.eq.f32.partialorder %v1850_v4, 8.507059e+37 }
 0xbab   : > { %v1828_v45 = vsub.f32 1.0, %v1827_v44 }
 0xbad   : > { %v1829_v47 = vmul.f32 %v2470_v43, %v1828_v45 }
 0xbae   : > { %v2472_v54 = vpop.eup %2471 }
 0xbaf   : > { %v1842_v58 = vmul.f32 %v2472_v54, %v1825_v41  ;;  %v1830_v59 = vadd.f32 %v2470_v43, %v1829_v47  ;;  %vm1847_vm8 = vweird.f32 %v2472_v54 }
 0xbb0   : > { %vm1848_vm1 = vmor %vm1846_vm9, %vm1847_vm8 }
 0xbb1   : > { %v1843_v53 = vsub.f32 1.0, %v1842_v58  ;;  %v1834_v0 = vsel %vm1833_vm6, %v2470_v43, %v1830_v59 }
 0xbb2   : > { %v1839_v1 = vsel %vm1836_vm7, %v1838_v60, %v1834_v0 }
 0xbb3   : > { %v1863_v63 = vmul.f32 %v1861_v61, %v1839_v1  ;;  %v1844_v3 = vmul.f32 %v2472_v54, %v1843_v53 }
 0xbb5   : > { %v1865_v9 = vadd.f32 %v1863_v63, %v1859_v56  ;;  %v1845_v24 = vadd.f32 %v2472_v54, %v1844_v3 }
 0xbb7   : > { %1870 = vrot.lane.b32.xlu2 %v1865_v9, %s2490_s27  ;;  %v1849_v14 = vsel %vm1848_vm1, %v2472_v54, %v1845_v24 }
 0xbb8   : > { %v1854_v6 = vsel %vm1851_vm11, %v1853_v5, %v1849_v14 }
 0xbb9   : > { %v1864_v16 = vmul.f32 %v1862_v15, %v1854_v6 }
 0xbbb   : > { %v1866_v11 = vadd.f32 %v1864_v16, %v1859_v56 }
 0xbbd   : > { %1872 = vrot.lane.b32.xlu0 %v1866_v11, %s2490_s27 }
 0xc11   : > { %v1871_v25 = vpop.permute.xlu2 %1870 }
 0xc12   : > { %v3084_v22 = vsel %vm761_vm4, 0.0, %v1871_v25 }
 0xc13   : > { %v1891_v27 = vmul.f32 %v2680_v31, %v3084_v22  ;;  %v1894_v32 = vmul.f32 %v2650_v18, %v3084_v22  ;;  %v1888_v31 = vmul.f32 %v2692_v39, %v3084_v22 }
 0xc2f   : > { %v1873_v12 = vpop.permute.xlu0 %1872 }
 0xc30   : > { %v3087_v19 = vsel %vm761_vm4, %v1871_v25, %v1873_v12  ;;  %v1879_v26 = vsel %vm761_vm4, %v1873_v12, 0.0  ;;  %vm3237_vm4 = vcmask 1039360  }
 0xc31   : > { %1975 = vrot.lane.b32.xlu0 %v1879_v26, %s2497_s5  ;;  %v2402_v8 = vpack.i.bf16 %v3087_v19, %v3084_v22  ;;  %v1892_v13 = vmul.f32 %v3087_v19, %v2685_v35  ;;  %v1895_v29 = vmul.f32 %v3087_v19, %v2663_v23  ;;  %v1889_v35 = vmul.f32 %v3087_v19, %v2702_v42 }
 0xc32   : > { %v1896_v23 = vmul.f32 %v2648_v17, %v1879_v26  ;;  %v1893_v18 = vmul.f32 %v2675_v28, %v1879_v26  ;;  %v1883_v34 = vmul.f32 %v3087_v19, %v2728_v57  ;;  %v1884_v36 = vmul.f32 %v2716_v51, %v1879_v26 }
 0xc33   : > { %2403 = vrot.lane.b32.xlu1 %v2402_v8, %s2494_s3  ;;  %2398 = vrot.lane.b32.xlu2 %v2402_v8, %s2497_s5  ;;  %v2412_v30 = vpack.i.bf16 %v1892_v13, %v1891_v27  ;;  %v2407_v20 = vpack.i.bf16 %v1895_v29, %v1894_v32  ;;  %v2417_v33 = vpack.i.bf16 %v1889_v35, %v1888_v31 }
 0xc34   : > { %v1882_v42 = vmul.f32 %v2718_v52, %v3084_v22  ;;  %v1890_v39 = vmul.f32 %v2690_v38, %v1879_v26  ;;  %v1886_v17 = vmul.f32 %v3087_v19, %v2724_v55  ;;  %v1885_v28 = vmul.f32 %v2714_v50, %v3084_v22 }
 0xc35   : > { %v1887_v52 = vmul.f32 %v2708_v48, %v1879_v26 }
 0xc36   : > { %v2422_v37 = vpack.i.bf16 %v1883_v34, %v1882_v42  ;;  %v2427_v51 = vpack.i.bf16 %v1886_v17, %v1885_v28  ;;  %v1880_v17 = vmul.f32 %v2640_v7, %v3084_v22 }
 0xc39   : > { %2413 = vrot.lane.b32.xlu0 %v2412_v30, %s3232_s2 }
 0xc3b   : > { %1939 = vrot.lane.b32.xlu2 %v1879_v26, %s2494_s3  ;;  %2408 = vrot.lane.b32.xlu1 %v2407_v20, %s2495_s0 }
 0xc41   : > { %2418 = vrot.lane.b32.xlu0 %v2417_v33, %s3233_s7 }
 0xc43   : > { %1988 = vrot.lane.b32.xlu2 %v1896_v23, %s2495_s0  ;;  %1965 = vrot.lane.b32.xlu1 %v1893_v18, %s3232_s2 }
 0xc49   : > { %1916 = vrot.lane.b32.xlu0 %v1884_v36, %s3234_s28 }
 0xc4b   : > { %1952 = vrot.lane.b32.xlu1 %v1890_v39, %s3233_s7  ;;  %2423 = vrot.lane.b32.xlu2 %v2422_v37, %s3234_s28  ;;  %s3241_s28 = sshll.u32 %s3243_s30, 3 }
 0xc4c   : > { %s710_s25 = scalar_lea.vmem %s3202_s23, %s3241_s28 }
 0xc51   : > { %2433 = vrot.lane.b32.xlu0 %v2402_v8, %s3236_s24 }
 0xc53   : > { %2428 = vrot.lane.b32.xlu1 %v2427_v51, %s3235_s29  ;;  %1929 = vrot.lane.b32.xlu2 %v1887_v52, %s3235_s29  ;;  %v1881_v51 = vmul.f32 %v2642_v10, %v3087_v19 }
 0xc5b   : > { %1903 = vrot.lane.b32.xlu1 %v1879_v26, %s3236_s24 }
 0xc8d   : > { %v2399_v38 = vpop.permute.xlu2 %2398 }
 0xc8e   : > { %v2401_v47 = vunpack.i.h.bf16 %v2399_v38  ;;  %v2400_v49 = vunpack.i.l.bf16 %v2399_v38 }
 0xc90   : > { %v1977_v3 = vsel %vm929_vm15, %v2400_v49, %v2401_v47 }
 0xc95   : > { %v1940_v40 = vpop.permute.xlu2 %1939 }
 0xc9d   : > { %v1989_v50 = vpop.permute.xlu2 %1988 }
 0xca3   : > { %v1976_v57 = vpop.permute.xlu0 %1975 }
 0xca4   : > { %v1978_v4 = vsel %vm929_vm15, %v2401_v47, %v1976_v57 }
 0xca5   : > { %v2404_v62 = vpop.permute.xlu1 %2403  ;;  %v2424_v11 = vpop.permute.xlu2 %2423 }
 0xca6   : > { %v2406_v1 = vunpack.i.h.bf16 %v2404_v62  ;;  %v2405_v2 = vunpack.i.l.bf16 %v2404_v62  ;;  %v2426_v27 = vunpack.i.h.bf16 %v2424_v11  ;;  %v2425_v29 = vunpack.i.l.bf16 %v2424_v11 }
 0xca8   : > { %v1941_v14 = vsel %vm887_vm12, %v2405_v2, %v2406_v1  ;;  %v1942_v12 = vsel %vm887_vm12, %v2406_v1, %v1940_v40  ;;  %v1918_v18 = vsel %vm859_vm3, %v2425_v29, %v2426_v27  ;;  %v1867_v40 = vld [vmem:[%s3199_s20] sm:$0x3]  ;;  %vm3239_vm12 = vcmask 588800  }
 0xca9   : > { %v2039_v2 = vld [vmem:[%s3200_s21] sm:$0xf] }
 0xcab   : > { %v2414_v21 = vpop.permute.xlu0 %2413 }
 0xcac   : > { %v2416_v44 = vunpack.i.h.bf16 %v2414_v21  ;;  %v2415_v45 = vunpack.i.l.bf16 %v2414_v21 }
 0xcad   : > { %v2409_v55 = vpop.permute.xlu1 %2408  ;;  %v1930_v33 = vpop.permute.xlu2 %1929 }
 0xcae   : > { %v2411_v41 = vunpack.i.h.bf16 %v2409_v55  ;;  %v2410_v43 = vunpack.i.l.bf16 %v2409_v55  ;;  %v1967_v61 = vsel %vm918_vm14, %v2415_v45, %v2416_v44 }
 0xcaf   : > { %v2000_v24 = vpack.c.bf16 %v1977_v3, %v1967_v61 }
 0xcb0   : > { %v1990_v46 = vsel %vm943_vm10, %v2410_v43, %v2411_v41  ;;  %v1991_v48 = vsel %vm943_vm10, %v2411_v41, %v1989_v50  ;;  %vm3238_vm10 = vmmov %vm3237_vm4 }
 0xcb1   : > { %v2002_v54 = vpack.c.bf16 %v1990_v46, %v1990_v46  ;;  %v2003_v56 = vpack.c.bf16 %v1991_v48, %v1991_v48 }
 0xcb3   : > { %v2419_v58 = vpop.permute.xlu0 %2418  ;;  %v2008_v59 = vsel %vm948_vm0, %v2002_v54, 0  ;;  %v2011_v60 = vsel %vm948_vm0, %v2003_v56, 0 }
 0xcb4   : > { %v2421_v53 = vunpack.i.h.bf16 %v2419_v58  ;;  %v2420_v0 = vunpack.i.l.bf16 %v2419_v58  ;;  %2016 = vmatpush.bf16.msra.mxu0 %v2008_v59  ;;  %2029 = vmatpush.bf16.msra.mxu1 %v2011_v60 }
 0xcb5   : > { %v1966_v63 = vpop.permute.xlu1 %1965 }
 0xcb6   : > { %v1968_v9 = vsel %vm918_vm14, %v2416_v44, %v1966_v63  ;;  %v1954_v15 = vsel %vm904_vm13, %v2420_v0, %v2421_v53 }
 0xcb7   : > { %v2001_v5 = vpack.c.bf16 %v1978_v4, %v1968_v9  ;;  %v1998_v6 = vpack.c.bf16 %v1954_v15, %v1941_v14 }
 0xcb8   : > { %2017 = vmatpush.bf16.msra.mxu0 %v2000_v24  ;;  %v2040_v24 = vld [vmem:[%s3201_s22] sm:$0xf] }
 0xcb9   : > { %2030 = vmatpush.bf16.msra.mxu1 %v2001_v5 }
 0xcbb   : > { %v1917_v16 = vpop.permute.xlu0 %1916 }
 0xcbc   : > { %2018 = vmatpush.bf16.msra.mxu0 %v1998_v6  ;;  %v1919_v23 = vsel %vm859_vm3, %v2426_v27, %v1917_v16 }
 0xcbd   : > { %v1953_v25 = vpop.permute.xlu1 %1952 }
 0xcbe   : > { %v1955_v26 = vsel %vm904_vm13, %v2421_v53, %v1953_v25  ;;  %vm3240_vm13 = vmmov %vm3239_vm12 }
 0xcbf   : > { %v1999_v8 = vpack.c.bf16 %v1955_v26, %v1942_v12 }
 0xcc1   : > { %2031 = vmatpush.bf16.msra.mxu1 %v1999_v8 }
 0xcc3   : > { %v2434_v13 = vpop.permute.xlu0 %2433 }
 0xcc4   : > { %v2436_v32 = vunpack.i.h.bf16 %v2434_v13  ;;  %v2435_v20 = vunpack.i.l.bf16 %v2434_v13 }
 0xcc5   : > { %v2429_v30 = vpop.permute.xlu1 %2428 }
 0xcc6   : > { %v2431_v35 = vunpack.i.h.bf16 %v2429_v30  ;;  %v2430_v31 = vunpack.i.l.bf16 %v2429_v30  ;;  %v1905_v37 = vsel %vm3237_vm4, %v2435_v20, %v2436_v32 }
 0xcc7   : > { %v1994_v52 = vpack.c.bf16 %v1905_v37, %v1880_v17 }
 0xcc8   : > { %v1931_v34 = vsel %vm876_vm2, %v2430_v31, %v2431_v35  ;;  %v1932_v36 = vsel %vm876_vm2, %v2431_v35, %v1930_v33 }
 0xcc9   : > { %v1996_v42 = vpack.c.bf16 %v1931_v34, %v1918_v18  ;;  %v1997_v39 = vpack.c.bf16 %v1932_v36, %v1919_v23 }
 0xccb   : > { %2019 = vmatpush.bf16.msra.mxu0 %v1996_v42  ;;  %2032 = vmatpush.bf16.msra.mxu1 %v1997_v39 }
 0xccd   : > { %v1904_v28 = vpop.permute.xlu1 %1903 }
 0xcce   : > { %v1906_v38 = vsel %vm3238_vm10, %v2436_v32, %v1904_v28 }
 0xccf   : > { %v1995_v57 = vpack.c.bf16 %v1906_v38, %v1881_v51  ;;  %2020 = vmatpush.bf16.msra.mxu0 %v1994_v52 }
 0xcd1   : > { %2033 = vmatpush.bf16.msra.mxu1 %v1995_v57 }
 0xcd2   : > { %2178 = vmatmul.msk.bf16.vlgmr.msra.gmra.mxu0 %vm3239_vm12, %v1867_v40 }
 0xcd4   : > { %2179 = vmatmul.msk.bf16.vlgmr.msra.gmra.mxu1 %vm3240_vm13, %v1867_v40 }
 0xd4f   : > { %v2022_v62 = vpop.f32.mrf.mxu0 }
 0xd50   : > { %v2047_v7 = vmul.f32 %v2022_v62, %v2022_v62  ;;  %v2041_v22 = vsel %vm948_vm0, %v2022_v62, 0.0 }
 0xd51   : > { %v2035_v21 = vpop.f32.mrf.mxu1 }
 0xd52   : > { %v2048_v10 = vmul.f32 %v2035_v21, %v2035_v21  ;;  %v2042_v19 = vsel %vm948_vm0, %v2035_v21, 0.0  ;;  %v2049_v55 = vsel %vm948_vm0, %v2047_v7, 0.0 }
 0xd53   : > { %v2043_v41 = vadd.f32 %v2042_v19, %v2041_v22 }
 0xd54   : > { %v2050_v43 = vsel %vm948_vm0, %v2048_v10, 0.0 }
 0xd55   : > { %2044 = vadd.xlane.f32.xlu2 %v2043_v41  ;;  %v2051_v50 = vadd.f32 %v2050_v43, %v2049_v55 }
 0xd57   : > { %2052 = vadd.xlane.f32.xlu0 %v2051_v50  ;;  %v2024_v44 = vpop.f32.mrf.mxu0 }
 0xd59   : > { %v2037_v45 = vpop.f32.mrf.mxu1 }
 0xdc8   : > { %v2045_v46 = vpop.xlane.xlu2 %2044 }
 0xdc9   : > { %v2046_v48 = vmul.f32 0.00390625, %v2045_v46 }
 0xdca   : > { %v2053_v47 = vpop.xlane.xlu0 %2052 }
 0xdcb   : > { %v2055_v49 = vmul.f32 %v2046_v48, %v2046_v48  ;;  %v2054_v54 = vmul.f32 0.00390625, %v2053_v47 }
 0xdcd   : > { %v2056_v56 = vsub.f32 %v2054_v54, %v2055_v49 }
 0xdcf   : > { %v2057_v58 = vmax.f32 %v2056_v56, 0.0 }
 0xdd1   : > { %v2058_v59 = vadd.f32 1e-05, %v2057_v58 }
 0xdd3   : > { %2473 = vrsqrt.f32 %v2058_v59  ;;  %vm2065_vm15 = vweird.f32 %v2058_v59 }
 0xdd9   : > { %v2474_v60 = vpop.eup %2473 }
 0xdda   : > { %v2060_v61 = vmul.f32 %v2474_v60, %v2058_v59  ;;  %vm2066_vm14 = vweird.f32 %v2474_v60 }
 0xddb   : > { %vm2067_vm1 = vmor %vm2065_vm15, %vm2066_vm14 }
 0xddc   : > { %v2061_v53 = vmul.f32 %v2474_v60, %v2060_v61 }
 0xdde   : > { %v2062_v0 = vmul.f32 0.5, %v2061_v53 }
 0xde0   : > { %v2063_v1 = vsub.f32 1.5, %v2062_v0 }
 0xde2   : > { %v2064_v63 = vmul.f32 %v2474_v60, %v2063_v1 }
 0xde4   : > { %v2068_v3 = vsel %vm2067_vm1, %v2474_v60, %v2064_v63 }
 0xde5   : > { %v2069_v4 = vmul.f32 %v2068_v3, %v2039_v2 }
 0xde7   : > { %2074 = vperm.xlu1 %2274, %v2069_v4   ;;  %v2070_v9 = vmul.f32 %v2069_v4, %v2046_v48 }
 0xde9   : > { %v2071_v5 = vsub.f32 %v2040_v24, %v2070_v9 }
 0xdef   : > { %2081 = vperm.xlu1 %2274, %v2071_v5  }
 0xe59   : > { %v2075_v15 = vpop.permute.xlu1 %2074 }
 0xe5a   : > { %v2078_v14 = vmul.f32 %v2075_v15, %v2035_v21  ;;  %v2077_v6 = vmul.f32 %v2075_v15, %v2022_v62 }
 0xe61   : > { %v2082_v16 = vpop.permute.xlu1 %2081 }
 0xe62   : > { %v2085_v11 = vadd.f32 %v2082_v16, %v2078_v14  ;;  %v2084_v25 = vadd.f32 %v2082_v16, %v2077_v6 }
 0xe64   : > { %2475 = vtanh.f32 %v2085_v11 }
 0xe65   : > { %2477 = vtanh.f32 %v2084_v25 }
 0xe6a   : > { %v2476_v12 = vpop.eup %2475 }
 0xe6b   : > { %v2090_v26 = vrot.slane %v2476_v12, 4  ;;  %v2478_v8 = vpop.eup %2477 }
 0xe6d   : > { %v2091_v13 = vsel %vm948_vm0, %v2478_v8, %v2090_v26 }
 0xe6e   : > { %2093 = vst [vmem:[%s710_s25] sm:$0xff] %v2091_v13 }
 0xe6f PF: > { %s33_s4 = sadd.s32 1, %s2485_s4  }
 0xe70   : > { %p30_p4 = scmp.ge.s32.totalorder %s33_s4, 4  }
 0xe72   :  { %32 = sbr.rel (!%p30_p4) target bundleno = 9 (0x9), region = 142 }

</bundles_post_ra>
